<compile_context>
chip_gen: v5e
topology: v5e:2x2
jax: 0.10.0
libtpu: 0.0.40
codegen_flags: <defaults>
</compile_context>

<pallas_src>
import jax
import jax.numpy as jnp
import numpy as np
from jax.experimental import pallas as pl
from jax.experimental.pallas import tpu as pltpu

EPS = 1e-5


# ----------------------------------------------------------------------------
# Pallas kernel: fused upsample(2x, nearest) + 3x3 conv + bias/BN + ReLU for
# one batch element per grid step.  Works on (H*W, Cin) with channels on the
# lane axis; emits (H*W, 4*Cout) where the 4 = (row-parity, col-parity) of the
# 2x-upsampled output pixel.
# ----------------------------------------------------------------------------
def make_kernel(H, W, Cin, Cout):
    HW = H * W

    def kernel(x_ref, w_ref, t_ref, out_ref):
        x2d = x_ref[0].astype(jnp.float32)                       # (HW, Cin)

        # Column-validity masks, hoisted (computed once per grid step).
        w_idx = jax.lax.broadcasted_iota(jnp.int32, (HW, Cin), 0) % W
        left_ok = w_idx >= 1                                     # col j-1 valid
        right_ok = w_idx <= W - 2                                # col j+1 valid

        zrow = jnp.zeros((W, Cin), jnp.float32)
        zcol = jnp.zeros((1, Cin), jnp.float32)

        # Column-shifted views, masked ONCE.  The mask depends only on the
        # column index, which is invariant under whole-row shifts, so the
        # masked arrays can be row-shifted afterwards with no extra selects.
        xl = jnp.where(left_ok,
                       jnp.concatenate([zcol, x2d[: HW - 1]], axis=0), 0.0)
        xr = jnp.where(right_ok,
                       jnp.concatenate([x2d[1:], zcol], axis=0), 0.0)

        def row_up(v):    # v[i-1, j]; zero row at i == 0 (image top edge)
            return jnp.concatenate([zrow, v[: HW - W]], axis=0)

        def row_dn(v):    # v[i+1, j]; zero row at i == H-1 (image bottom edge)
            return jnp.concatenate([v[W:], zrow], axis=0)

        # im2col over the ORIGINAL image's 3x3 neighbourhood:
        # column layout ((dh+1)*3 + (dw+1))*Cin + ci, matching the fused weight.
        cols = [row_up(xl), row_up(x2d), row_up(xr),              # dh = -1
                xl,          x2d,         xr,                     # dh =  0
                row_dn(xl), row_dn(x2d), row_dn(xr)]              # dh = +1
        patches = jnp.concatenate(cols, axis=1)                   # (HW, 9*Cin)

        # One MXU matmul: (HW, 9*Cin) x (9*Cin, 4*Cout).  BN scale is already
        # folded into the weight; only the additive shift + ReLU remain.
        acc = jnp.dot(patches, w_ref[...],
                      preferred_element_type=jnp.float32)         # (HW, 4*Cout)
        out_ref[0] = jnp.maximum(acc + t_ref[...], 0.0).astype(out_ref.dtype)

    return kernel


# ----------------------------------------------------------------------------
# Wrapper: layout conversion + pallas_call
# ----------------------------------------------------------------------------
def up_conv_pallas(x_nchw, weff, shift4):
    B, Cin, H, W = x_nchw.shape
    Cout4 = weff.shape[1]
    Cout = Cout4 // 4
    HW = H * W

    x_flat = jnp.transpose(x_nchw, (0, 2, 3, 1)).reshape(B, HW, Cin)

    out = pl.pallas_call(
        make_kernel(H, W, Cin, Cout),
        out_shape=jax.ShapeDtypeStruct((B, HW, Cout4), jnp.float32),
        grid_spec=pltpu.PrefetchScalarGridSpec(
            num_scalar_prefetch=0,
            grid=(B,),
            in_specs=[
                pl.BlockSpec((1, HW, Cin), lambda b: (b, 0, 0)),
                pl.BlockSpec((9 * Cin, Cout4), lambda b: (0, 0)),
                pl.BlockSpec((1, Cout4), lambda b: (0, 0)),
            ],
            out_specs=pl.BlockSpec((1, HW, Cout4), lambda b: (b, 0, 0)),
        ),
        compiler_params=pltpu.CompilerParams(
            dimension_semantics=("parallel",)),
    )(x_flat, weff, shift4)

    # Un-interleave the (row-parity, col-parity, channel) packing -> NCHW.
    out = out.reshape(B, H, W, 2, 2, Cout)
    out = jnp.transpose(out, (0, 1, 3, 2, 4, 5)).reshape(B, 2 * H, 2 * W, Cout)
    return jnp.transpose(out, (0, 3, 1, 2))


# ----------------------------------------------------------------------------
# Parameter preparation: fused upsample+conv weight with BN scale folded in,
# and the folded conv-bias + BN shift.
# ----------------------------------------------------------------------------
def build_fused_params(w_conv, bias, gamma, beta, mean, var):
    """w_conv: (Cout, Cin, 3, 3) torch-layout conv weight."""
    Cout, Cin, _, _ = w_conv.shape
    w_np = np.asarray(w_conv, np.float32)

    # For output parity p (0/1) along a spatial axis, tap k of the 3x3 kernel
    # on the 2x-upsampled grid reads the original pixel at offset row_map[p][k].
    row_map = {0: (-1, 0, 0), 1: (0, 0, 1)}

    weff = np.zeros((3, 3, Cin, 2, 2, Cout), np.float32)
    for pr in range(2):
        for pc in range(2):
            for kh in range(3):
                dh = row_map[pr][kh]
                for kw in range(3):
                    dw = row_map[pc][kw]
                    weff[dh + 1, dw + 1, :, pr, pc, :] += w_np[:, :, kh, kw].T
    weff = weff.reshape(9 * Cin, 4 * Cout)

    # Fold conv bias + eval-mode BN:  y = conv*s + t,  s folded into weights.
    s = np.asarray(gamma, np.float32) / np.sqrt(np.asarray(var, np.float32) + EPS)
    t = ((np.asarray(bias, np.float32) - np.asarray(mean, np.float32)) * s
         + np.asarray(beta, np.float32))
    s4 = np.tile(s, 4)                       # column order (pr, pc, co)
    t4 = np.tile(t, 4)

    weff_scaled = jnp.asarray(weff * s4[None, :])
    shift4 = jnp.asarray(t4.reshape(1, 4 * Cout))
    return weff_scaled, shift4


# ----------------------------------------------------------------------------
# Pure-JAX reference (mirrors the PyTorch forward, eval-mode BN)
# ----------------------------------------------------------------------------
def up_conv_ref(x, w_conv, bias, gamma, beta, mean, var):
    xu = jnp.repeat(jnp.repeat(x, 2, axis=2), 2, axis=3)        # nearest 2x
    o = jax.lax.conv_general_dilated(
        xu, w_conv, (1, 1), ((1, 1), (1, 1)),
        dimension_numbers=("NCHW", "OIHW", "NCHW"))
    o = o + bias.reshape(1, -1, 1, 1)
    shp = (1, -1, 1, 1)
    o = ((o - mean.reshape(shp))
         * (gamma.reshape(shp) / jnp.sqrt(var.reshape(shp) + EPS))
         + beta.reshape(shp))
    return jnp.maximum(o, 0.0)


# ----------------------------------------------------------------------------
if __name__ == "__main__":
    B, Cin, Cout, H, W = 2, 16, 32, 16, 16

    key = jax.random.PRNGKey(0)
    ks = jax.random.split(key, 8)

    x = jax.random.normal(ks[0], (B, Cin, H, W), jnp.float32)
    w_conv = 0.2 * jax.random.normal(ks[1], (Cout, Cin, 3, 3), jnp.float32)
    bias = 0.1 * jax.random.normal(ks[2], (Cout,), jnp.float32)
    gamma = 1.0 + 0.2 * jax.random.normal(ks[3], (Cout,), jnp.float32)
    beta = 0.1 * jax.random.normal(ks[4], (Cout,), jnp.float32)
    mean = 0.1 * jax.random.normal(ks[5], (Cout,), jnp.float32)
    var = jax.random.uniform(ks[6], (Cout,), jnp.float32, 0.5, 1.5)

    weff, shift4 = build_fused_params(w_conv, bias, gamma, beta, mean, var)

    out_kernel = up_conv_pallas(x, weff, shift4)
    jax.block_until_ready(out_kernel)

    out_reference = up_conv_ref(x, w_conv, bias, gamma, beta, mean, var)
    jax.block_until_ready(out_reference)

    np.testing.assert_allclose(np.asarray(out_kernel),
                               np.asarray(out_reference),
                               rtol=2e-2, atol=2e-2)
    print("KERNEL_OK")
</pallas_src>

<mosaic_0001>
module attributes {stable_mosaic.version = 11 : i64} {
  func.func @kernel(%arg0: i32, %arg1: memref<1x256x16xf32, #tpu.memory_space<vmem>>, %arg2: memref<144x128xf32, #tpu.memory_space<vmem>>, %arg3: memref<1x128xf32, #tpu.memory_space<vmem>>, %arg4: memref<1x256x128xf32, #tpu.memory_space<vmem>>) attributes {dimension_semantics = [#tpu.dimension_semantics<parallel>], iteration_bounds = array<i64: 2>, scalar_prefetch = 0 : i64, scratch_operands = 0 : i64, tpu.core_type = #tpu.core_type<tc>, window_params = [{transform_indices = @transform_0, window_bounds = array<i64: 1, 256, 16>}, {pipeline_mode = #tpu.pipeline_mode<synchronous>, transform_indices = @transform_1, window_bounds = array<i64: 144, 128>}, {pipeline_mode = #tpu.pipeline_mode<synchronous>, transform_indices = @transform_2, window_bounds = array<i64: 1, 128>}, {transform_indices = @transform_3, window_bounds = array<i64: 1, 256, 128>}]} {
    %c0 = arith.constant 0 : index
    %c0_0 = arith.constant 0 : index
    %c0_1 = arith.constant 0 : index
    %0 = vector.load %arg1[%c0, %c0_0, %c0_1] : memref<1x256x16xf32, #tpu.memory_space<vmem>>, vector<1x256x16xf32>
    %1 = vector.shape_cast %0 : vector<1x256x16xf32> to vector<256x16xf32>
    %2 = tpu.iota {dimensions = array<i32: 0>} : vector<256x16xi32>
    %c16_i32 = arith.constant 16 : i32
    %c0_i32 = arith.constant 0 : i32
    %3 = arith.cmpi eq, %c16_i32, %c0_i32 : i32
    %c1_i32 = arith.constant 1 : i32
    %4 = arith.select %3, %c1_i32, %c16_i32 : i32
    %5 = vector.broadcast %4 : i32 to vector<256x16xi32>
    %6 = arith.remsi %2, %5 : vector<256x16xi32>
    %c0_i32_2 = arith.constant 0 : i32
    %7 = vector.broadcast %c0_i32_2 : i32 to vector<256x16xi32>
    %8 = arith.cmpi ne, %6, %7 : vector<256x16xi32>
    %c0_i32_3 = arith.constant 0 : i32
    %9 = vector.broadcast %c0_i32_3 : i32 to vector<256x16xi32>
    %10 = arith.cmpi slt, %6, %9 : vector<256x16xi32>
    %c0_i32_4 = arith.constant 0 : i32
    %11 = arith.cmpi slt, %4, %c0_i32_4 : i32
    %12 = vector.broadcast %11 : i1 to vector<256x16xi1>
    %13 = vector.broadcast %12 : vector<256x16xi1> to vector<256x16xi1>
    %14 = arith.xori %10, %13 : vector<256x16xi1>
    %15 = arith.andi %14, %8 : vector<256x16xi1>
    %16 = vector.broadcast %4 : i32 to vector<256x16xi32>
    %17 = arith.addi %6, %16 : vector<256x16xi32>
    %18 = arith.select %15, %17, %6 : vector<256x16xi1>, vector<256x16xi32>
    %c1_i32_5 = arith.constant 1 : i32
    %19 = vector.broadcast %c1_i32_5 : i32 to vector<256x16xi32>
    %20 = arith.cmpi sge, %18, %19 : vector<256x16xi32>
    %c14_i32 = arith.constant 14 : i32
    %21 = vector.broadcast %c14_i32 : i32 to vector<256x16xi32>
    %22 = arith.cmpi sle, %18, %21 : vector<256x16xi32>
    %cst = arith.constant 0.000000e+00 : f32
    %23 = vector.broadcast %cst : f32 to vector<16x16xf32>
    %cst_6 = arith.constant 0.000000e+00 : f32
    %24 = vector.broadcast %cst_6 : f32 to vector<1x16xf32>
    %25 = vector.extract_strided_slice %1 {offsets = [0, 0], sizes = [255, 16], strides = [1, 1]} : vector<256x16xf32> to vector<255x16xf32>
    %26 = tpu.concatenate %24, %25 in 0 : vector<1x16xf32>, vector<255x16xf32> -> vector<256x16xf32>
    %cst_7 = arith.constant 0.000000e+00 : f32
    %27 = vector.broadcast %cst_7 : f32 to vector<256x16xf32>
    %28 = arith.select %20, %26, %27 : vector<256x16xi1>, vector<256x16xf32>
    %29 = vector.extract_strided_slice %1 {offsets = [1, 0], sizes = [255, 16], strides = [1, 1]} : vector<256x16xf32> to vector<255x16xf32>
    %30 = tpu.concatenate %29, %24 in 0 : vector<255x16xf32>, vector<1x16xf32> -> vector<256x16xf32>
    %cst_8 = arith.constant 0.000000e+00 : f32
    %31 = vector.broadcast %cst_8 : f32 to vector<256x16xf32>
    %32 = arith.select %22, %30, %31 : vector<256x16xi1>, vector<256x16xf32>
    %33 = vector.extract_strided_slice %28 {offsets = [0, 0], sizes = [240, 16], strides = [1, 1]} : vector<256x16xf32> to vector<240x16xf32>
    %34 = tpu.concatenate %23, %33 in 0 : vector<16x16xf32>, vector<240x16xf32> -> vector<256x16xf32>
    %35 = vector.extract_strided_slice %1 {offsets = [0, 0], sizes = [240, 16], strides = [1, 1]} : vector<256x16xf32> to vector<240x16xf32>
    %36 = tpu.concatenate %23, %35 in 0 : vector<16x16xf32>, vector<240x16xf32> -> vector<256x16xf32>
    %37 = vector.extract_strided_slice %32 {offsets = [0, 0], sizes = [240, 16], strides = [1, 1]} : vector<256x16xf32> to vector<240x16xf32>
    %38 = tpu.concatenate %23, %37 in 0 : vector<16x16xf32>, vector<240x16xf32> -> vector<256x16xf32>
    %39 = vector.extract_strided_slice %28 {offsets = [16, 0], sizes = [240, 16], strides = [1, 1]} : vector<256x16xf32> to vector<240x16xf32>
    %40 = tpu.concatenate %39, %23 in 0 : vector<240x16xf32>, vector<16x16xf32> -> vector<256x16xf32>
    %41 = vector.extract_strided_slice %1 {offsets = [16, 0], sizes = [240, 16], strides = [1, 1]} : vector<256x16xf32> to vector<240x16xf32>
    %42 = tpu.concatenate %41, %23 in 0 : vector<240x16xf32>, vector<16x16xf32> -> vector<256x16xf32>
    %43 = vector.extract_strided_slice %32 {offsets = [16, 0], sizes = [240, 16], strides = [1, 1]} : vector<256x16xf32> to vector<240x16xf32>
    %44 = tpu.concatenate %43, %23 in 0 : vector<240x16xf32>, vector<16x16xf32> -> vector<256x16xf32>
    %45 = tpu.concatenate %34, %36, %38, %28, %1, %32, %40, %42, %44 in 1 : vector<256x16xf32>, vector<256x16xf32>, vector<256x16xf32>, vector<256x16xf32>, vector<256x16xf32>, vector<256x16xf32>, vector<256x16xf32>, vector<256x16xf32>, vector<256x16xf32> -> vector<256x144xf32>
    %c0_9 = arith.constant 0 : index
    %c0_10 = arith.constant 0 : index
    %46 = vector.load %arg2[%c0_9, %c0_10] : memref<144x128xf32, #tpu.memory_space<vmem>>, vector<144x128xf32>
    %cst_11 = arith.constant dense<0.000000e+00> : vector<256x128xf32>
    %47 = tpu.matmul %45, %46, %cst_11 {dimension_numbers = #tpu.dot_dimension_numbers<[1], [0], [0], [1], [0, 0, 1, 1], [], []>} : vector<256x144xf32>, vector<144x128xf32>, vector<256x128xf32> -> vector<256x128xf32>
    %c0_12 = arith.constant 0 : index
    %c0_13 = arith.constant 0 : index
    %48 = vector.load %arg3[%c0_12, %c0_13] : memref<1x128xf32, #tpu.memory_space<vmem>>, vector<1x128xf32>
    %49 = vector.broadcast %48 : vector<1x128xf32> to vector<256x128xf32>
    %50 = arith.addf %47, %49 : vector<256x128xf32>
    %cst_14 = arith.constant 0.000000e+00 : f32
    %51 = vector.broadcast %cst_14 : f32 to vector<256x128xf32>
    %52 = arith.maximumf %50, %51 : vector<256x128xf32>
    %c0_15 = arith.constant 0 : index
    %c0_16 = arith.constant 0 : index
    %c0_17 = arith.constant 0 : index
    %53 = vector.load %arg4[%c0_15, %c0_16, %c0_17] : memref<1x256x128xf32, #tpu.memory_space<vmem>>, vector<1x256x128xf32>
    %54 = vector.shape_cast %53 : vector<1x256x128xf32> to vector<256x128xf32>
    %55 = vector.shape_cast %52 : vector<256x128xf32> to vector<1x256x128xf32>
    tpu.vector_store %arg4[%c0_15, %c0_16, %c0_17], %55 {strides = array<i32>} : memref<1x256x128xf32, #tpu.memory_space<vmem>>, vector<1x256x128xf32>,
    return
  }
  func.func @transform_0(%arg0: i32) -> (i32, i32, i32) {
    %c0_i32 = arith.constant 0 : i32
    %c0_i32_0 = arith.constant 0 : i32
    %c0_i32_1 = arith.constant 0 : i32
    return %arg0, %c0_i32, %c0_i32_0 : i32, i32, i32
  }
  func.func @transform_1(%arg0: i32) -> (i32, i32) {
    %c0_i32 = arith.constant 0 : i32
    %c0_i32_0 = arith.constant 0 : i32
    %c0_i32_1 = arith.constant 0 : i32
    return %c0_i32, %c0_i32_0 : i32, i32
  }
  func.func @transform_2(%arg0: i32) -> (i32, i32) {
    %c0_i32 = arith.constant 0 : i32
    %c0_i32_0 = arith.constant 0 : i32
    %c0_i32_1 = arith.constant 0 : i32
    return %c0_i32, %c0_i32_0 : i32, i32
  }
  func.func @transform_3(%arg0: i32) -> (i32, i32, i32) {
    %c0_i32 = arith.constant 0 : i32
    %c0_i32_0 = arith.constant 0 : i32
    %c0_i32_1 = arith.constant 0 : i32
    return %arg0, %c0_i32, %c0_i32_0 : i32, i32, i32
  }
}

</mosaic_0001>

<bundles_post_ra>
// kernel: tpu_custom_call.1
= control target key start
LH: loop header
LB: loop body
LE: loop exit
PB: predicated region body
PF: predicated region fallthrough
CT: control target
= control target key end

     0   :  { %8 = vsyncpa [#allocation3], 0  ;;  %s4820_s0 = inlined_call_operand.vmem [shape: f32[2,256,16], index: 0, kind: input, shape index: {}]   ;;  %s4821_s1 = inlined_call_operand.vmem [shape: f32[144,128], index: 1, kind: input, shape index: {}]   ;;  %s4822_s2 = inlined_call_operand.vmem [shape: f32[1,128], index: 2, kind: input, shape index: {}]   ;;  %s4823_s3 = inlined_call_operand.hbm [shape: f32[2,256,128], index: 3, kind: output, shape index: {}]  }
   0x1   :  { %10 = vsyncpa [#allocation3 + $0x1], 0  ;;  %s3158_s12 = smov 0   ;;  %s3160_s13 = smov 0  }
   0x2   :  { %s3162_s14 = smov 0   ;;  %s3164_s15 = smov 0  }
   0x3 LB: > { %s3179_s16 = sadd.s32 4294967295, %s3126_s15   ;;  %s2378_s17 = sadd.s32 4294967294, %s3126_s15   ;;  %s3126_s15 = sphi %s3164_s15, %s5070_s15   ;;  %s3122_s14 = sphi %s3162_s14, %s5069_s14   ;;  %s3118_s13 = sphi %s3160_s13, %s5068_s13   ;;  %s3114_s12 = sphi %s3158_s12, %s5067_s12  }
   0x4   : > { %s3183_s18 = sadd.s32 1, %s3126_s15   ;;  %s91_s19 = sadd.s32 1, %s3122_s14 }
   0x5   : > { %s88_s20 = ssub.s32 %s3126_s15, %s3183_s18  ;;  %p101_p0 = scmp.ne.s32.totalorder %s3122_s14, %s3118_s13 }
   0x6   : > { %p89_p1 = scmp.eq.s32.totalorder %s88_s20, 0  ;;  %p102_p2 = scmp.eq.s32.totalorder %s3179_s16, 1 }
   0x7   : > { %p107_p3 = scmp.ne.s32.totalorder %s3118_s13, %s3114_s12  ;;  %p108_p4 = scmp.eq.s32.totalorder %s2378_s17, 1 }
   0x8   : > { %s3194_s21 = scalar_select %p89_p1, %s3122_s14, %s91_s19  }
   0x9   : > { %p3196_p5 = por %p102_p2, %p101_p0  ;;  %p3200_p6 = por %p108_p4, %p107_p3 }
   0xa   : > { %p2381_p7 = scmp.ge.s32.totalorder %s3126_s15, 1  ;;  %p140_p8 = scmp.lt.s32.totalorder %s3126_s15, 3 }
   0xc   : > { %p141_p9 = pnand %p2381_p7, %p140_p8 }
   0xe   : > { %144 = sbr.rel (%p141_p9) target bundleno = 587 (0x24b), region = 32 }
  0x13   : > { %p164_p10 = scmp.lt.s32.totalorder %s3179_s16, 1  ;;  %v4824_v7 = vmov 0.0   ;;  %s3129_s29 = smov 16   ;;  %v201_v25 = vlaneseq  ;;  %vm843_vm0 = vcmask 1046528   ;;  %vm714_vm14 = vcmask 1040384  }
  0x14   : > { %s3130_s30 = smov 32   ;;  %s3131_s4 = smov 48  }
  0x15   : > { %s165_s24 = scalar_select %p164_p10, %s3179_s16, 1  ;;  %v3292_v29 = vshrl.u32 %v201_v25, 7 }
  0x16   : > { %s3132_s5 = smov 64   ;;  %s3133_s10 = smov 96  }
  0x17   : > { %s2420_s25 = sshll.u32 %s165_s24, 8  ;;  %v203_v36 = vadd.s32 8, %v3292_v29  ;;  %v209_v48 = vadd.s32 56, %v3292_v29  ;;  %v205_v57 = vadd.s32 24, %v3292_v29  ;;  %v207_v59 = vadd.s32 40, %v3292_v29  ;;  %s3134_s11 = smov 80  }
  0x18   : > { %s3211_s28 = scalar_lea.vmem %s4820_s0, %s2420_s25  ;;  %v211_v25 = vadd.s32 72, %v3292_v29  ;;  %s3135_s17 = smov 112  }
  0x19   : > { %v3214_v0 = vld [vmem:[%s3211_s28 + $0x38] sm:$0xff]  ;;  %v3217_v1 = vld [vmem:[%s3211_s28 + $0x40] sm:$0xff]  ;;  %v3236_v9 = vld [vmem:[%s3211_s28 + $0x48] sm:$0xff]  ;;  %v245_v43 = vand.u32 15, %v203_v36  ;;  %v287_v58 = vand.u32 15, %v209_v48  ;;  %s3084_s25 = scalar_lea.hbm %s4823_s3, 512 }
  0x1a   : > { %v3220_v2 = vld [vmem:[%s3211_s28 + $0x18] sm:$0xff]  ;;  %v2525_v3 = vpack.i.bf16 %v3217_v1, %v3214_v0  ;;  %v3225_v4 = vld [vmem:[%s3211_s28 + $0x20] sm:$0xff]  ;;  %v3241_v10 = vld [vmem:[%s3211_s28 + $0x50] sm:$0xff]  ;;  %v857_v55 = vrot.slane %v3214_v0, 1  ;;  %v859_v56 = vrot.slane %v3217_v1, 1 }
  0x1b   : > { %v3228_v5 = vld [vmem:[%s3211_s28] sm:$0xff]  ;;  %v2515_v6 = vpack.i.bf16 %v3225_v4, %v3220_v2  ;;  %v3244_v11 = vld [vmem:[%s3211_s28 + $0x28] sm:$0xff]  ;;  %v3247_v12 = vld [vmem:[%s3211_s28 + $0x30] sm:$0xff]  ;;  %v2530_v15 = vpack.i.bf16 %v3241_v10, %v3236_v9  ;;  %v849_v50 = vrot.slane %v3220_v2, 1  ;;  %vm651_vm1 = vcmp.le.s32.totalorder %v245_v43, 14 }
  0x1c   : > { %v2505_v8 = vpack.i.bf16 %v3228_v5, %v4824_v7  ;;  %2526 = vrot.lane.b32.xlu2 %v2525_v3, %s3129_s29  ;;  %v3250_v13 = vld [vmem:[%s3211_s28 + $0x8] sm:$0xff]  ;;  %v3253_v14 = vld [vmem:[%s3211_s28 + $0x10] sm:$0xff]  ;;  %v2520_v16 = vpack.i.bf16 %v3247_v12, %v3244_v11  ;;  %v3263_v18 = vld [vmem:[%s3211_s28 + $0x78] sm:$0xff]  ;;  %v844_v53 = vrot.slane %v3228_v5, 1  ;;  %v860_v63 = vsel %vm843_vm0, %v857_v55, %v859_v56 }
  0x1d   : > { %2516 = vrot.lane.b32.xlu1 %v2515_v6, %s3129_s29  ;;  %v2510_v17 = vpack.i.bf16 %v3253_v14, %v3250_v13  ;;  %v3268_v19 = vld [vmem:[%s3211_s28 + $0x80] sm:$0xff]  ;;  %v3271_v20 = vld [vmem:[%s3211_s28 + $0x68] sm:$0xff]  ;;  %v3274_v21 = vld [vmem:[%s3211_s28 + $0x70] sm:$0xff]  ;;  %v845_v39 = vrot.slane %v3250_v13, 1  ;;  %v847_v40 = vrot.slane %v3253_v14, 1  ;;  %v861_v3 = vrot.slane %v3236_v9, 1 }
  0x1e   : > { %2506 = vrot.lane.b32.xlu0 %v2505_v8, %s3129_s29  ;;  %v3277_v22 = vld [vmem:[%s3211_s28 + $0x58] sm:$0xff]  ;;  %v3280_v23 = vld [vmem:[%s3211_s28 + $0x60] sm:$0xff]  ;;  %v2545_v24 = vpack.i.bf16 %v3268_v19, %v3263_v18  ;;  %v2540_v26 = vpack.i.bf16 %v3274_v21, %v3271_v20  ;;  %v3290_v28 = vld [vmem:[%s3211_s28 + $0xa8] sm:$0xff]  ;;  %v259_v6 = vand.u32 15, %v205_v57  ;;  %v851_v8 = vrot.slane %v3225_v4, 1 }
  0x1f   : > { %v2535_v27 = vpack.i.bf16 %v3280_v23, %v3277_v22  ;;  %v3297_v30 = vld [vmem:[%s3211_s28 + $0xb0] sm:$0xff]  ;;  %v3300_v31 = vld [vmem:[%s3211_s28 + $0x98] sm:$0xff]  ;;  %v3303_v32 = vld [vmem:[%s3211_s28 + $0xa0] sm:$0xff]  ;;  %v848_v49 = vsel %vm843_vm0, %v845_v39, %v847_v40  ;;  %v3360_v60 = vsel %vm843_vm0, %v847_v40, %v849_v50  ;;  %v3365_v62 = vsel %vm843_vm0, %v844_v53, %v845_v39 }
  0x20   : > { %v3306_v33 = vld [vmem:[%s3211_s28 + $0x88] sm:$0xff]  ;;  %v3309_v34 = vld [vmem:[%s3211_s28 + $0x90] sm:$0xff]  ;;  %v2560_v35 = vpack.i.bf16 %v3297_v30, %v3290_v28  ;;  %v2555_v37 = vpack.i.bf16 %v3303_v32, %v3300_v31  ;;  %v3324_v41 = vld [vmem:[%s3211_s28 + $0xd8] sm:$0xff]  ;;  %v3362_v61 = vsel %vm651_vm1, %v848_v49, 0.0  ;;  %4921 = vst [vmem:[#allocation9_spill] sm:$0xff] %v3365_v62  ;;  %vm657_vm2 = vcmp.le.s32.totalorder %v287_v58, 14 }
  0x21   : > { %v3318_v38 = vpack.i.bf16 %v3309_v34, %v3306_v33  ;;  %v3327_v42 = vld [vmem:[%s3211_s28 + $0xe0] sm:$0xff]  ;;  %v3333_v44 = vld [vmem:[%s3211_s28 + $0xc8] sm:$0xff]  ;;  %v3336_v45 = vld [vmem:[%s3211_s28 + $0xd0] sm:$0xff]  ;;  %4920 = vst [vmem:[#allocation8_spill] sm:$0xff] %v3362_v61  ;;  %v3382_v36 = vsel %vm843_vm0, %v859_v56, %v861_v3  ;;  %v852_v39 = vsel %vm843_vm0, %v849_v50, %v851_v8  ;;  %vm3390_vm3 = vcmp.le.s32.totalorder %v259_v6, 14 }
  0x22   : > { %4918 = vst [vmem:[#allocation6_spill] sm:$0xff] %v3333_v44  ;;  %v3339_v46 = vld [vmem:[%s3211_s28 + $0xb8] sm:$0xff]  ;;  %v3342_v47 = vld [vmem:[%s3211_s28 + $0xc0] sm:$0xff]  ;;  %v2575_v51 = vpack.i.bf16 %v3327_v42, %v3324_v41  ;;  %v2570_v52 = vpack.i.bf16 %v3336_v45, %v3333_v44  ;;  %v3388_v40 = vld [vmem:[%s3211_s28 + $0xe8] sm:$0xff]  ;;  %v871_v53 = vrot.slane %v3274_v21, 1  ;;  %v863_v50 = vrot.slane %v3241_v10, 1 }
  0x23   : > { %4917 = vst [vmem:[#allocation5_spill] sm:$0xff] %v3318_v38  ;;  %v2565_v54 = vpack.i.bf16 %v3342_v47, %v3339_v46  ;;  %v865_v56 = vrot.slane %v3277_v22, 1  ;;  %v867_v58 = vrot.slane %v3280_v23, 1  ;;  %v3415_v6 = vsel %vm3390_vm3, %v852_v39, 0.0 }
  0x24   : > { %2531 = vrot.lane.b32.xlu2 %v2530_v15, %s3129_s29  ;;  %4919 = vst [vmem:[#allocation7_spill] sm:$0xff] %v3342_v47  ;;  %v853_v15 = vrot.slane %v3244_v11, 1  ;;  %v219_v39 = vadd.s32 136, %v3292_v29 }
  0x25   : > { %2521 = vrot.lane.b32.xlu1 %v2520_v16, %s3129_s29  ;;  %v273_v16 = vand.u32 15, %v207_v59  ;;  %4922 = vst [vmem:[#allocation10_spill] sm:$0xff] %v3382_v36 }
  0x26   : > { %2511 = vrot.lane.b32.xlu0 %v2510_v17, %s3129_s29  ;;  %v855_v17 = vrot.slane %v3247_v12, 1 }
  0x27   : > { %vm3394_vm4 = vcmp.le.s32.totalorder %v273_v16, 14 }
  0x28   : > { %v856_v49 = vsel %vm843_vm0, %v853_v15, %v855_v17  ;;  %v3418_v16 = vsel %vm843_vm0, %v855_v17, %v857_v55  ;;  %v217_v55 = vadd.s32 120, %v3292_v29 }
  0x29   : > { %4929 = vst [vmem:[#allocation13_spill] sm:$0xff] %v3418_v16 }
  0x2c   : > { %2546 = vrot.lane.b32.xlu2 %v2545_v24, %s3129_s29  ;;  %v215_v24 = vadd.s32 104, %v3292_v29 }
  0x2d   : > { %2541 = vrot.lane.b32.xlu1 %v2540_v26, %s3129_s29  ;;  %v2585_v26 = vpack.i.bf16 %v3360_v60, %v3362_v61 }
  0x2e   : > { %2536 = vrot.lane.b32.xlu0 %v2535_v27, %s3129_s29  ;;  %v213_v27 = vadd.s32 88, %v3292_v29 }
  0x30   : > { %v315_v57 = vand.u32 15, %v213_v27  ;;  %v221_v27 = vadd.s32 152, %v3292_v29 }
  0x32   : > { %vm661_vm7 = vcmp.le.s32.totalorder %v315_v57, 14  ;;  %v881_v57 = vrot.slane %v3300_v31, 1 }
  0x34   : > { %2561 = vrot.lane.b32.xlu2 %v2560_v35, %s3129_s29  ;;  %v2580_v35 = vpack.i.bf16 %v3365_v62, %v4824_v7  ;;  %v371_v7 = vand.u32 15, %v221_v27 }
  0x35   : > { %2556 = vrot.lane.b32.xlu1 %v2555_v37, %s3129_s29  ;;  %v3384_v37 = vsel %vm657_vm2, %v860_v63, 0.0  ;;  %v3411_v63 = vsel %vm843_vm0, %v851_v8, %v853_v15  ;;  %v864_v8 = vsel %vm843_vm0, %v861_v3, %v863_v50  ;;  %v868_v15 = vsel %vm843_vm0, %v865_v56, %v867_v58 }
  0x36   : > { %2551 = vrot.lane.b32.xlu0 %v3318_v38, %s3129_s29  ;;  %4923 = vst [vmem:[#allocation11_spill] sm:$0xff] %v3384_v37  ;;  %v2600_v59 = vpack.i.bf16 %v3382_v36, %v3384_v37  ;;  %v2590_v17 = vpack.i.bf16 %v3411_v63, %v3415_v6  ;;  %v3441_v3 = vsel %vm843_vm0, %v863_v50, %v865_v56  ;;  %v343_v36 = vand.u32 15, %v217_v55 }
  0x37   : > { %4928 = vst [vmem:[#allocation12_spill] sm:$0xff] %v3411_v63  ;;  %v877_v50 = vrot.slane %v3306_v33, 1  ;;  %v879_v56 = vrot.slane %v3309_v34, 1  ;;  %vm669_vm8 = vcmp.le.s32.totalorder %v371_v7, 14  ;;  %v232_v63 = vadd.s32 240, %v3292_v29 }
  0x38   : > { %4933 = vst [vmem:[#allocation17_spill] sm:$0xff] %v3441_v3  ;;  %vm665_vm9 = vcmp.le.s32.totalorder %v343_v36, 14 }
  0x3c   : > { %2576 = vrot.lane.b32.xlu2 %v2575_v51, %s3129_s29  ;;  %v869_v51 = vrot.slane %v3271_v20, 1 }
  0x3d   : > { %2571 = vrot.lane.b32.xlu1 %v2570_v52, %s3129_s29  ;;  %v329_v52 = vand.u32 15, %v215_v24  ;;  %v3422_v24 = vsel %vm3394_vm4, %v856_v49, 0.0 }
  0x3e   : > { %2566 = vrot.lane.b32.xlu0 %v2565_v54, %s3129_s29  ;;  %v301_v54 = vand.u32 15, %v211_v25  ;;  %4930 = vst [vmem:[#allocation14_spill] sm:$0xff] %v3422_v24  ;;  %v873_v25 = vrot.slane %v3263_v18, 1 }
  0x3f   : > { %vm663_vm5 = vcmp.le.s32.totalorder %v329_v52, 14  ;;  %v3446_v52 = vsel %vm843_vm0, %v867_v58, %v869_v51 }
  0x40   : > { %vm659_vm6 = vcmp.le.s32.totalorder %v301_v54, 14  ;;  %v3436_v43 = vsel %vm843_vm0, %v871_v53, %v873_v25  ;;  %4935 = vst [vmem:[#allocation19_spill] sm:$0xff] %v3446_v52  ;;  %v3448_v54 = vsel %vm661_vm7, %v868_v15, 0.0  ;;  %v885_v15 = vrot.slane %v3290_v28, 1 }
  0x41   : > { %4931 = vst [vmem:[#allocation15_spill] sm:$0xff] %v3436_v43  ;;  %v3443_v49 = vsel %vm659_vm6, %v864_v8, 0.0  ;;  %v2610_v8 = vpack.i.bf16 %v3446_v52, %v3448_v54 }
  0x42   : > { %4934 = vst [vmem:[#allocation18_spill] sm:$0xff] %v3443_v49 }
  0x43   : > { %4936 = vst [vmem:[#allocation20_spill] sm:$0xff] %v3448_v54  ;;  %v893_v54 = vrot.slane %v3333_v44, 1 }
  0x44   : > { %2586 = vrot.lane.b32.xlu2 %v2585_v26, %s3130_s30  ;;  %v872_v26 = vsel %vm843_vm0, %v869_v51, %v871_v53  ;;  %v883_v53 = vrot.slane %v3303_v32, 1  ;;  %v357_v51 = vand.u32 15, %v219_v39  ;;  %v223_v39 = vadd.s32 168, %v3292_v29 }
  0x45   : > { %2581 = vrot.lane.b32.xlu1 %v2580_v35, %s3130_s30  ;;  %v2595_v35 = vpack.i.bf16 %v3418_v16, %v3422_v24  ;;  %v3438_v48 = vsel %vm663_vm5, %v872_v26, 0.0  ;;  %v875_v26 = vrot.slane %v3268_v19, 1 }
  0x46   : > { %1033 = vrot.lane.b32.xlu0 %v3388_v40, %s3129_s29  ;;  %4932 = vst [vmem:[#allocation16_spill] sm:$0xff] %v3438_v48  ;;  %v2615_v58 = vpack.i.bf16 %v3436_v43, %v3438_v48  ;;  %v884_v27 = vsel %vm843_vm0, %v881_v57, %v883_v53  ;;  %vm667_vm10 = vcmp.le.s32.totalorder %v357_v51, 14  ;;  %v225_v43 = vadd.s32 184, %v3292_v29  ;;  %s2421_s29 = sshll.u32 %s3179_s16, 8 }
  0x47   : > { %v876_v55 = vsel %vm843_vm0, %v873_v25, %v875_v26  ;;  %v3472_v48 = vsel %vm843_vm0, %v883_v53, %v885_v15  ;;  %v3474_v52 = vsel %vm669_vm8, %v884_v27, 0.0  ;;  %v3477_v7 = vsel %vm843_vm0, %v875_v26, %v877_v50  ;;  %s2312_s6 = scalar_lea.hbm %s4823_s3, %s2421_s29 }
  0x48   : > { %4937 = vst [vmem:[#allocation21_spill] sm:$0xff] %v3472_v48  ;;  %v3480_v36 = vsel %vm665_vm9, %v876_v55, 0.0  ;;  %v3483_v25 = vsel %vm843_vm0, %v879_v56, %v881_v57  ;;  %v895_v27 = vrot.slane %v3336_v45, 1  ;;  %v385_v26 = vand.u32 15, %v223_v39  ;;  %s2315_s7 = sshll.u32 %s2312_s6, 4  ;;  %s2316_s7 = int_to_ptr.hbm [resolvable:$true] %s2315_s7 }
  0x49   : > { %4938 = vst [vmem:[#allocation22_spill] sm:$0xff] %v3474_v52  ;;  %v399_v55 = vand.u32 15, %v225_v43  ;;  %v891_v57 = vrot.slane %v3342_v47, 1  ;;  %s3078_s9 = sshra.s32 %s2316_s7, 4  ;;  %s3079_s9 = int_to_ptr.hbm [resolvable:$true] %s3078_s9 }
  0x4a   : > { %4939 = vst [vmem:[#allocation23_spill] sm:$0xff] %v3477_v7  ;;  %vm671_vm12 = vcmp.le.s32.totalorder %v385_v26, 14  ;;  %s3080_s19 = scalar_lea.hbm %s3079_s9, 256  ;;  %p3085_p0 = scmp.lt.s32.totalorder %s3079_s9, %s4823_s3 }
  0x4b   : > { %4940 = vst [vmem:[#allocation24_spill] sm:$0xff] %v3480_v36  ;;  %vm673_vm13 = vcmp.le.s32.totalorder %v399_v55, 14  ;;  %v238_v55 = vand.u32 15, %v3292_v29  ;;  %p3081_p11 = scmp.ne.s32.totalorder %s3079_s9, %s3080_s19  ;;  %p3086_p1 = scmp.lt.s32.totalorder %s3084_s25, %s3080_s19 }
  0x4c   : > { %2601 = vrot.lane.b32.xlu2 %v2600_v59, %s3130_s30  ;;  %v2605_v59 = vpack.i.bf16 %v3441_v3, %v3443_v49  ;;  %4941 = vst [vmem:[#allocation25_spill] sm:$0xff] %v3483_v25  ;;  %v229_v3 = vadd.s32 216, %v3292_v29 }
  0x4d   : > { %2596 = vrot.lane.b32.xlu1 %v2595_v35, %s3130_s30  ;;  %v227_v35 = vadd.s32 200, %v3292_v29  ;;  %vm618_vm15 = vcmp.ge.s32.totalorder %v238_v55, 1  ;;  %p3082_p12 = pnand %p3081_p11, %p3196_p5  ;;  %p3087_p2 = por %p3086_p1, %p3085_p0 }
  0x4e   : > { %2591 = vrot.lane.b32.xlu0 %v2590_v17, %s3130_s30  ;;  %v880_v17 = vsel %vm843_vm0, %v877_v50, %v879_v56  ;;  %v887_v50 = vrot.slane %v3297_v30, 1  ;;  %v897_v56 = vrot.slane %v3324_v41, 1 }
  0x4f   : > { %v3485_v51 = vsel %vm667_vm10, %v880_v17, 0.0  ;;  %v413_v53 = vand.u32 15, %v227_v35  ;;  %v2630_v17 = vpack.i.bf16 %v3472_v48, %v3474_v52  ;;  %v896_v35 = vsel %vm843_vm0, %v893_v54, %v895_v27  ;;  %p3083_p13 = pneg %p3082_p12 }
  0x50   : > { %4942 = vst [vmem:[#allocation26_spill] sm:$0xff] %v3485_v51  ;;  %v888_v43 = vsel %vm843_vm0, %v885_v15, %v887_v50  ;;  %v3508_v49 = vsel %vm843_vm0, %v895_v27, %v897_v56  ;;  %v3519_v15 = vsel %vm843_vm0, %v891_v57, %v893_v54  ;;  %v231_v27 = vadd.s32 232, %v3292_v29 }
  0x51   : > { %vm675_vm11 = vcmp.le.s32.totalorder %v413_v53, 14  ;;  %4944 = vst [vmem:[#allocation28_spill] sm:$0xff] %v3508_v49  ;;  %v718_v52 = vrot.slane %v3253_v14, 7  ;;  %p3088_p3 = pnand %p3087_p2, %p3083_p13 }
  0x52   : > { %4948 = vst [vmem:[#allocation32_spill] sm:$0xff] %v3519_v15  ;;  %v441_v48 = vand.u32 15, %v231_v27 }
  0x54   : > { %2616 = vrot.lane.b32.xlu2 %v2615_v58, %s3130_s30  ;;  %v889_v58 = vrot.slane %v3339_v46, 1  ;;  %vm679_vm2 = vcmp.le.s32.totalorder %v441_v48, 14 }
  0x55   : > { %2611 = vrot.lane.b32.xlu1 %v2610_v8, %s3130_s30  ;;  %v2625_v8 = vpack.i.bf16 %v3483_v25, %v3485_v51  ;;  %v214_v25 = vadd.s32 96, %v3292_v29 }
  0x56   : > { %2606 = vrot.lane.b32.xlu0 %v2605_v59, %s3130_s30  ;;  %v3499_v59 = vpack.i.bf16 %v3477_v7, %v3480_v36  ;;  %v892_v39 = vsel %vm843_vm0, %v889_v58, %v891_v57  ;;  %v3511_v7 = vsel %vm675_vm11, %v896_v35, 0.0  ;;  %v3514_v53 = vsel %vm843_vm0, %v887_v50, %v889_v58  ;;  %v3531_v35 = vld [vmem:[%s3211_s28 + $0xf0] sm:$0xff] }
  0x57   : > { %4945 = vst [vmem:[#allocation29_spill] sm:$0xff] %v3511_v7  ;;  %v3516_v36 = vsel %vm671_vm12, %v888_v43, 0.0  ;;  %v3524_v26 = vsel %vm673_vm13, %v892_v39, 0.0  ;;  %v427_v50 = vand.u32 15, %v229_v3  ;;  %v899_v58 = vrot.slane %v3327_v42, 1 }
  0x58   : > { %4943 = vst [vmem:[#allocation27_spill] sm:$0xff] %v3499_v59  ;;  %v2645_v54 = vpack.i.bf16 %v3508_v49, %v3511_v7  ;;  %v901_v57 = vrot.slane %v3388_v40, 1  ;;  %v2640_v43 = vpack.i.bf16 %v3519_v15, %v3524_v26  ;;  %v716_v39 = vrot.slane %v3250_v13, 7 }
  0x59   : > { %4946 = vst [vmem:[#allocation30_spill] sm:$0xff] %v3514_v53  ;;  %v204_v3 = vadd.s32 16, %v3292_v29  ;;  %vm677_vm1 = vcmp.le.s32.totalorder %v427_v50, 14  ;;  %v900_v49 = vsel %vm843_vm0, %v897_v56, %v899_v58  ;;  %v206_v7 = vadd.s32 32, %v3292_v29 }
  0x5a   : > { %4947 = vst [vmem:[#allocation31_spill] sm:$0xff] %v3516_v36  ;;  %v3559_v56 = vsel %vm677_vm1, %v900_v49, 0.0  ;;  %v4953_v50 = vrot.slane %v3531_v35, 1  ;;  %v210_v49 = vadd.s32 64, %v3292_v29  ;;  %v719_v48 = vsel %vm714_vm14, %v716_v39, %v718_v52 }
  0x5b   : > { %4949 = vst [vmem:[#allocation33_spill] sm:$0xff] %v3524_v26  ;;  %v252_v55 = vand.u32 15, %v204_v3  ;;  %v726_v3 = vrot.slane %v3247_v12, 7 }
  0x5c   : > { %2631 = vrot.lane.b32.xlu2 %v2630_v17, %s3130_s30  ;;  %v715_v17 = vrot.slane %v3228_v5, 7  ;;  %4950 = vst [vmem:[#allocation34_spill] sm:$0xff] %v3531_v35  ;;  %v294_v38 = vand.u32 15, %v210_v49  ;;  %v736_v49 = vrot.slane %v3277_v22, 7 }
  0x5d   : > { %2626 = vrot.lane.b32.xlu1 %v2625_v8, %s3130_s30  ;;  %v2635_v8 = vpack.i.bf16 %v3514_v53, %v3516_v36  ;;  %v208_v53 = vadd.s32 48, %v3292_v29  ;;  %v3548_v36 = vsel %vm843_vm0, %v899_v58, %v901_v57  ;;  %4952 = vst [vmem:[#allocation36_spill] sm:$0xff] %v3559_v56  ;;  %v904_v58 = vsel %vm843_vm0, %v901_v57, %v4953_v50 }
  0x5e   : > { %2621 = vrot.lane.b32.xlu0 %v3499_v59, %s3130_s30  ;;  %v810_v37 = vsel %vm714_vm14, 0.0, %v715_v17  ;;  %4951 = vst [vmem:[#allocation35_spill] sm:$0xff] %v3548_v36  ;;  %v3552_v15 = vsel %vm714_vm14, %v715_v17, %v716_v39  ;;  %v266_v17 = vand.u32 15, %v206_v7  ;;  %vm620_vm3 = vcmp.ge.s32.totalorder %v252_v55, 1 }
  0x5f   : > { %v3554_v27 = vsel %vm618_vm15, %v810_v37, 0.0  ;;  %v724_v37 = vrot.slane %v3244_v11, 7  ;;  %v280_v26 = vand.u32 15, %v208_v53  ;;  %v728_v57 = vrot.slane %v3214_v0, 7 }
  0x60   : > { %v212_v50 = vadd.s32 80, %v3292_v29  ;;  %v2650_v7 = vpack.i.bf16 %v3548_v36, %v3559_v56  ;;  %v3576_v53 = vsel %vm679_vm2, %v904_v58, 0.0  ;;  %vm3582_vm4 = vcmp.ge.s32.totalorder %v266_v17, 1 }
  0x61   : > { %4954 = vst [vmem:[#allocation37_spill] sm:$0xff] %v3576_v53  ;;  %vm624_vm5 = vcmp.ge.s32.totalorder %v280_v26, 1  ;;  %v727_v39 = vsel %vm714_vm14, %v724_v37, %v726_v3  ;;  %v3587_v55 = vsel %vm620_vm3, %v719_v48, 0.0  ;;  %v730_v58 = vrot.slane %v3217_v1, 7 }
  0x62   : > { %v732_v17 = vrot.slane %v3236_v9, 7  ;;  %v308_v36 = vand.u32 15, %v212_v50  ;;  %v734_v26 = vrot.slane %v3241_v10, 7  ;;  %v322_v48 = vand.u32 15, %v214_v25 }
  0x63   : > { %vm626_vm6 = vcmp.ge.s32.totalorder %v294_v38, 1 }
  0x64   : > { %2646 = vrot.lane.b32.xlu2 %v2645_v54, %s3130_s30  ;;  %v720_v54 = vrot.slane %v3220_v2, 7  ;;  %vm628_vm7 = vcmp.ge.s32.totalorder %v308_v36, 1  ;;  %v735_v24 = vsel %vm714_vm14, %v732_v17, %v734_v26  ;;  %vm630_vm8 = vcmp.ge.s32.totalorder %v322_v48, 1 }
  0x65   : > { %2641 = vrot.lane.b32.xlu1 %v2640_v43, %s3130_s30  ;;  %v722_v43 = vrot.slane %v3225_v4, 7  ;;  %v3630_v62 = vsel %vm714_vm14, %v734_v26, %v736_v49  ;;  %v3632_v36 = vsel %vm628_vm7, %v735_v24, 0.0  ;;  %v746_v24 = vrot.slane %v3268_v19, 7 }
  0x66   : > { %2636 = vrot.lane.b32.xlu0 %v2635_v8, %s3130_s30  ;;  %v2655_v8 = vpack.i.bf16 %v3552_v15, %v3554_v27  ;;  %v3580_v16 = vsel %vm714_vm14, %v718_v52, %v720_v54  ;;  %v3593_v52 = vsel %vm714_vm14, %v726_v3, %v728_v57  ;;  %4962 = vst [vmem:[#allocation43_spill] sm:$0xff] %v3630_v62  ;;  %vm1794_vm7 = vcmask 523264  }
  0x67   : > { %4955 = vst [vmem:[#allocation38_spill] sm:$0xff] %v3580_v16  ;;  %v723_v51 = vsel %vm714_vm14, %v720_v54, %v722_v43  ;;  %v3600_v54 = vsel %vm624_vm5, %v727_v39, 0.0  ;;  %v2660_v3 = vpack.i.bf16 %v3580_v16, %v3587_v55  ;;  %v3607_v56 = vsel %vm714_vm14, %v722_v43, %v724_v37 }
  0x68   : > { %4958 = vst [vmem:[#allocation39_spill] sm:$0xff] %v3600_v54  ;;  %v3611_v50 = vsel %vm3582_vm4, %v723_v51, 0.0  ;;  %v740_v39 = vrot.slane %v3271_v20, 7  ;;  %v2670_v25 = vpack.i.bf16 %v3593_v52, %v3600_v54  ;;  %v218_v37 = vadd.s32 128, %v3292_v29 }
  0x69   : > { %4959 = vst [vmem:[#allocation40_spill] sm:$0xff] %v3607_v56  ;;  %v2665_v61 = vpack.i.bf16 %v3607_v56, %v3611_v50  ;;  %v220_v51 = vadd.s32 144, %v3292_v29  ;;  %v742_v56 = vrot.slane %v3274_v21, 7  ;;  %vm1697_vm4 = vcmask 130048  }
  0x6a   : > { %4960 = vst [vmem:[#allocation41_spill] sm:$0xff] %v3611_v50  ;;  %v350_v50 = vand.u32 15, %v218_v37  ;;  %v752_v37 = vrot.slane %v3300_v31, 7 }
  0x6b   : > { %4963 = vst [vmem:[#allocation44_spill] sm:$0xff] %v3632_v36 }
  0x6c   : > { %2656 = vrot.lane.b32.xlu2 %v2655_v8, %s3131_s4  ;;  %v738_v8 = vrot.slane %v3280_v23, 7  ;;  %vm634_vm10 = vcmp.ge.s32.totalorder %v350_v50, 1 }
  0x6d   : > { %1156 = vrot.lane.b32.xlu1 %v3576_v53, %s3130_s30  ;;  %v216_v53 = vadd.s32 112, %v3292_v29 }
  0x6e   : > { %2651 = vrot.lane.b32.xlu0 %v2650_v7, %s3130_s30  ;;  %v731_v7 = vsel %vm714_vm14, %v728_v57, %v730_v58  ;;  %v739_v38 = vsel %vm714_vm14, %v736_v49, %v738_v8  ;;  %v3627_v57 = vsel %vm714_vm14, %v730_v58, %v732_v17  ;;  %v3635_v54 = vsel %vm714_vm14, %v738_v8, %v740_v39 }
  0x6f   : > { %v3624_v43 = vsel %vm626_vm6, %v731_v7, 0.0  ;;  %4961 = vst [vmem:[#allocation42_spill] sm:$0xff] %v3627_v57  ;;  %v336_v59 = vand.u32 15, %v216_v53  ;;  %v3638_v48 = vsel %vm630_vm8, %v739_v38, 0.0  ;;  %v744_v7 = vrot.slane %v3263_v18, 7 }
  0x70   : > { %4964 = vst [vmem:[#allocation45_spill] sm:$0xff] %v3635_v54  ;;  %v748_v58 = vrot.slane %v3306_v33, 7  ;;  %v364_v17 = vand.u32 15, %v220_v51  ;;  %v750_v53 = vrot.slane %v3309_v34, 7  ;;  %v2675_v49 = vpack.i.bf16 %v3627_v57, %v3624_v43 }
  0x71   : > { %4965 = vst [vmem:[#allocation46_spill] sm:$0xff] %v3638_v48  ;;  %v2680_v8 = vpack.i.bf16 %v3630_v62, %v3632_v36  ;;  %vm632_vm9 = vcmp.ge.s32.totalorder %v336_v59, 1  ;;  %v747_v38 = vsel %vm714_vm14, %v744_v7, %v746_v24  ;;  %v224_v57 = vadd.s32 176, %v3292_v29 }
  0x72   : > { %vm636_vm11 = vcmp.ge.s32.totalorder %v364_v17, 1  ;;  %v751_v51 = vsel %vm714_vm14, %v748_v58, %v750_v53  ;;  %v226_v62 = vadd.s32 192, %v3292_v29  ;;  %v3663_v36 = vsel %vm714_vm14, %v742_v56, %v744_v7 }
  0x73   : > { %4966 = vst [vmem:[#allocation47_spill] sm:$0xff] %v3663_v36  ;;  %v3668_v50 = vsel %vm714_vm14, %v746_v24, %v748_v58  ;;  %v3674_v17 = vsel %vm714_vm14, %v750_v53, %v752_v37  ;;  %v756_v7 = vrot.slane %v3290_v28, 7  ;;  %v392_v24 = vand.u32 15, %v224_v57 }
  0x74   : > { %2671 = vrot.lane.b32.xlu2 %v2670_v25, %s3131_s4  ;;  %v743_v25 = vsel %vm714_vm14, %v740_v39, %v742_v56  ;;  %v3671_v39 = vsel %vm634_vm10, %v747_v38, 0.0  ;;  %v754_v56 = vrot.slane %v3303_v32, 7  ;;  %v758_v58 = vrot.slane %v3297_v30, 7 }
  0x75   : > { %2666 = vrot.lane.b32.xlu1 %v2665_v61, %s3131_s4  ;;  %v222_v61 = vadd.s32 160, %v3292_v29  ;;  %v3665_v59 = vsel %vm632_vm9, %v743_v25, 0.0  ;;  %4968 = vst [vmem:[#allocation49_spill] sm:$0xff] %v3671_v39  ;;  %v760_v25 = vrot.slane %v3339_v46, 7  ;;  %v406_v53 = vand.u32 15, %v226_v62 }
  0x76   : > { %2661 = vrot.lane.b32.xlu0 %v2660_v3, %s3131_s4  ;;  %v3647_v26 = vpop.permute.xlu2 %2526  ;;  %v2685_v3 = vpack.i.bf16 %v3635_v54, %v3638_v48  ;;  %4967 = vst [vmem:[#allocation48_spill] sm:$0xff] %v3665_v59  ;;  %v3676_v48 = vsel %vm636_vm11, %v751_v51, 0.0  ;;  %v762_v38 = vrot.slane %v3342_v47, 7  ;;  %v755_v57 = vsel %vm714_vm14, %v752_v37, %v754_v56 }
  0x77   : > { %v378_v16 = vand.u32 15, %v222_v61  ;;  %v2690_v61 = vpack.i.bf16 %v3663_v36, %v3665_v59  ;;  %vm640_vm13 = vcmp.ge.s32.totalorder %v392_v24, 1  ;;  %v759_v51 = vsel %vm714_vm14, %v756_v7, %v758_v58 }
  0x78   : > { %vm642_vm15 = vcmp.ge.s32.totalorder %v406_v53, 1  ;;  %v763_v62 = vsel %vm714_vm14, %v760_v25, %v762_v38  ;;  %v228_v36 = vadd.s32 208, %v3292_v29  ;;  %v3709_v24 = vsel %vm714_vm14, %v758_v58, %v760_v25 }
  0x79   : > { %vm638_vm12 = vcmp.ge.s32.totalorder %v378_v16, 1  ;;  %v3702_v16 = vsel %vm714_vm14, %v754_v56, %v756_v7  ;;  %v3711_v53 = vsel %vm640_vm13, %v759_v51, 0.0  ;;  %v3716_v47 = vsel %vm642_vm15, %v763_v62, 0.0 }
  0x7a   : > { %v3704_v37 = vsel %vm638_vm12, %v755_v57, 0.0  ;;  %v420_v56 = vand.u32 15, %v228_v36  ;;  %v772_v7 = vrot.slane %v3388_v40, 7  ;;  %v3722_v57 = vld [vmem:[%s3211_s28 + $0xf8] sm:$0xff]  ;;  %v766_v58 = vrot.slane %v3336_v45, 7 }
  0x7b   : > { %4970 = vst [vmem:[#allocation51_spill] sm:$0xff] %v3722_v57  ;;  %v768_v25 = vrot.slane %v3324_v41, 7  ;;  %v2705_v36 = vpack.i.bf16 %v3702_v16, %v3704_v37  ;;  %v2710_v40 = vpack.i.bf16 %v3709_v24, %v3711_v53  ;;  %vm1761_vm6 = vcmask 392192  }
  0x7c   : > { %2686 = vrot.lane.b32.xlu2 %v2685_v3, %s3131_s4  ;;  %vm644_vm2 = vcmp.ge.s32.totalorder %v420_v56, 1  ;;  %vm1827_vm8 = vcmask 654336   ;;  %vm1860_vm9 = vcmask 785408   ;;  %vm1893_vm10 = vcmask 916480  }
  0x7d   : > { %2681 = vrot.lane.b32.xlu1 %v2680_v8, %s3131_s4  ;;  %v2700_v8 = vpack.i.bf16 %v3674_v17, %v3676_v48  ;;  %v3749_v56 = vsel %vm714_vm14, %v766_v58, %v768_v25 }
  0x7e   : > { %2676 = vrot.lane.b32.xlu0 %v2675_v49, %s3131_s4  ;;  %v3683_v3 = vpop.permute.xlu2 %2531  ;;  %v2695_v49 = vpack.i.bf16 %v3668_v50, %v3671_v39  ;;  %v230_v39 = vadd.s32 224, %v3292_v29 }
  0x7f   : > { %4969 = vst [vmem:[#allocation50_spill] sm:$0xff] %v3683_v3  ;;  %v764_v3 = vrot.slane %v3333_v44, 7 }
  0x80   : > { %v434_v51 = vand.u32 15, %v230_v39 }
  0x81   : > { %v3714_v44 = vsel %vm714_vm14, %v762_v38, %v764_v3  ;;  %v770_v38 = vrot.slane %v3327_v42, 7  ;;  %v767_v41 = vsel %vm714_vm14, %v764_v3, %v766_v58 }
  0x82   : > { %v2715_v62 = vpack.i.bf16 %v3714_v44, %v3716_v47  ;;  %vm646_vm3 = vcmp.ge.s32.totalorder %v434_v51, 1  ;;  %v3751_v3 = vsel %vm644_vm2, %v767_v41, 0.0  ;;  %v2735_v41 = vpack.i.bf16 %v3250_v13, %v3228_v5 }
  0x83   : > { %v771_v42 = vsel %vm714_vm14, %v768_v25, %v770_v38  ;;  %4973 = vst [vmem:[#allocation54_spill] sm:$0xff] %v3751_v3  ;;  %v3754_v51 = vsel %vm714_vm14, %v770_v38, %v772_v7  ;;  %v2760_v13 = vpack.i.bf16 %v3277_v22, %v3241_v10 }
  0x84   : > { %2701 = vrot.lane.b32.xlu2 %v2700_v8, %s3131_s4 }
  0x85   : > { %2696 = vrot.lane.b32.xlu1 %v2695_v49, %s3131_s4  ;;  %v774_v49 = vrot.slane %v3531_v35, 7 }
  0x86   : > { %2691 = vrot.lane.b32.xlu0 %v2690_v61, %s3131_s4  ;;  %v3718_v8 = vpop.permute.xlu2 %2546  ;;  %v448_v61 = vand.u32 15, %v232_v63  ;;  %v776_v63 = vrot.slane %v3722_v57, 7 }
  0x87   : > { %v775_v35 = vsel %vm714_vm14, %v772_v7, %v774_v49 }
  0x88   : > { %vm648_vm1 = vcmp.ge.s32.totalorder %v448_v61, 1  ;;  %v3742_v45 = vsel %vm714_vm14, %v774_v49, %v776_v63  ;;  %v2720_v49 = vpack.i.bf16 %v3749_v56, %v3751_v3  ;;  %v2745_v63 = vpack.i.bf16 %v3244_v11, %v3225_v4 }
  0x89   : > { %4971 = vst [vmem:[#allocation52_spill] sm:$0xff] %v3742_v45  ;;  %v3744_v39 = vsel %vm648_vm1, %v775_v35, 0.0  ;;  %vm1729_vm14 = vcmask 261120  }
  0x8a   : > { %4972 = vst [vmem:[#allocation53_spill] sm:$0xff] %v3744_v39  ;;  %v2730_v35 = vpack.i.bf16 %v3742_v45, %v3744_v39 }
  0x8c   : > { %2716 = vrot.lane.b32.xlu2 %v2715_v62, %s3131_s4  ;;  %v3756_v62 = vsel %vm646_vm3, %v771_v42, 0.0  ;;  %v2740_v42 = vpack.i.bf16 %v3220_v2, %v3253_v14 }
  0x8d   : > { %2711 = vrot.lane.b32.xlu1 %v2710_v40, %s3131_s4  ;;  %v2725_v58 = vpack.i.bf16 %v3754_v51, %v3756_v62 }
  0x8e   : > { %2706 = vrot.lane.b32.xlu0 %v2705_v36, %s3131_s4  ;;  %v3746_v61 = vpop.permute.xlu2 %2561 }
  0x8f   : > { %v3758_v36 = vpop.permute.xlu1 %2516 }
  0x90   : > { %v3760_v40 = vpop.permute.xlu0 %2506 }
  0x94   : > { %2731 = vrot.lane.b32.xlu2 %v2730_v35, %s3131_s4 }
  0x95   : > { %2726 = vrot.lane.b32.xlu1 %v2725_v58, %s3131_s4 }
  0x96   : > { %2721 = vrot.lane.b32.xlu0 %v2720_v49, %s3131_s4  ;;  %v3771_v7 = vpop.permute.xlu2 %2576 }
  0x97   : > { %v3773_v25 = vpop.permute.xlu1 %2521 }
  0x98   : > { %v2512_v38 = vpop.permute.xlu0 %2511 }
  0x99   : > { %v2514_v45 = vunpack.i.h.bf16 %v2512_v38  ;;  %v2513_v35 = vunpack.i.l.bf16 %v2512_v38 }
  0x9b   : > { %v1701_v2 = vsel %vm1697_vm4, %v3587_v55, %v2514_v45  ;;  %v1700_v5 = vsel %vm1697_vm4, %v3552_v15, %v2513_v35  ;;  %v2529_v45 = vunpack.i.h.bf16 %v3647_v26 }
  0x9c   : > { %2746 = vrot.lane.b32.xlu2 %v2745_v63, %s3132_s5  ;;  %v2750_v63 = vpack.i.bf16 %v3214_v0, %v3247_v12  ;;  %v3812_v0 = vld [vmem:[%s4821_s1 + $0x88] sm:$0xff]  ;;  %v2775_v12 = vpack.i.bf16 %v3306_v33, %v3268_v19 }
  0x9d   : > { %2741 = vrot.lane.b32.xlu1 %v2740_v42, %s3132_s5  ;;  %v2528_v42 = vunpack.i.l.bf16 %v3647_v26  ;;  %4974 = vst [vmem:[#allocation55_spill] sm:$0xff] %v3812_v0  ;;  %2137 = vmatpush.msra.mxu1 %v3812_v0 }
  0x9e   : > { %2736 = vrot.lane.b32.xlu0 %v2735_v41, %s3132_s5  ;;  %v2587_v49 = vpop.permute.xlu2 %2586  ;;  %v2755_v41 = vpack.i.bf16 %v3236_v9, %v3217_v1  ;;  %v1707_v9 = vsel %vm1697_vm4, %v3624_v43, %v2529_v45  ;;  %v2790_v45 = vpack.i.bf16 %v3339_v46, %v3297_v30 }
  0x9f   : > { %v2542_v58 = vpop.permute.xlu1 %2541  ;;  %v2589_v4 = vunpack.i.h.bf16 %v2587_v49  ;;  %v2588_v11 = vunpack.i.l.bf16 %v2587_v49  ;;  %v1706_v1 = vsel %vm1697_vm4, %v3593_v52, %v2528_v42 }
  0xa0   : > { %v3784_v39 = vpop.permute.xlu0 %2536  ;;  %v2544_v19 = vunpack.i.h.bf16 %v2542_v58  ;;  %v2543_v33 = vunpack.i.l.bf16 %v2542_v58 }
  0xa1   : > { %v3793_v14 = vsel %vm1729_vm14, %v1700_v5, %v2588_v11  ;;  %v3796_v38 = vsel %vm1729_vm14, %v1701_v2, %v2589_v4  ;;  %v2765_v11 = vpack.i.bf16 %v3271_v20, %v3280_v23  ;;  %v2770_v2 = vpack.i.bf16 %v3263_v18, %v3274_v21  ;;  %v3834_v5 = vld [vmem:[%s4821_s1 + $0x80] sm:$0xff] }
  0xa2   : > { %4975 = vst [vmem:[#allocation56_spill] sm:$0xff] %v3834_v5  ;;  %2138 = vmatpush.msra.mxu1 %v3834_v5  ;;  %v1712_v58 = vsel %vm1697_vm4, %v3635_v54, %v2543_v33  ;;  %v2538_v54 = vunpack.i.l.bf16 %v3784_v39 }
  0xa3   : > { %2385 = vmatmul.msk.f32.vlgmr.msra.gmra.mxu1 %vm1697_vm4, %v3360_v60 }
  0xa4   : > { %2761 = vrot.lane.b32.xlu2 %v2760_v13, %s3132_s5 }
  0xa5   : > { %2756 = vrot.lane.b32.xlu1 %v2755_v41, %s3132_s5  ;;  %v1713_v41 = vsel %vm1697_vm4, %v3665_v59, %v2544_v19 }
  0xa6   : > { %2751 = vrot.lane.b32.xlu0 %v2750_v63, %s3132_s5  ;;  %v2602_v10 = vpop.permute.xlu2 %2601  ;;  %v233_v63 = vadd.s32 248, %v3292_v29  ;;  %v2785_v29 = vpack.i.bf16 %v3290_v28, %v3303_v32  ;;  %v2518_v28 = vunpack.i.l.bf16 %v3758_v36 }
  0xa7   : > { %v2557_v22 = vpop.permute.xlu1 %2556  ;;  %v2604_v15 = vunpack.i.h.bf16 %v2602_v10  ;;  %v2603_v35 = vunpack.i.l.bf16 %v2602_v10 }
  0xa8   : > { %v3807_v49 = vpop.permute.xlu0 %2551  ;;  %v2559_v30 = vunpack.i.h.bf16 %v2557_v22  ;;  %v2558_v46 = vunpack.i.l.bf16 %v2557_v22 }
  0xa9   : > { %v3822_v26 = vsel %vm1729_vm14, %v1707_v9, %v2604_v15  ;;  %v3825_v4 = vsel %vm1729_vm14, %v1706_v1, %v2603_v35  ;;  %v2780_v15 = vpack.i.bf16 %v3300_v31, %v3309_v34  ;;  %v2509_v35 = vunpack.i.h.bf16 %v3760_v40 }
  0xaa   : > { %v2508_v1 = vunpack.i.l.bf16 %v3760_v40  ;;  %v455_v9 = vand.u32 15, %v233_v63  ;;  %v2805_v40 = vpack.i.bf16 %v3676_v48, %v3668_v50 }
  0xab   : > { %2386 = vmatmul.msk.f32.gmra.mxu1 %vm1697_vm4, %v3415_v6  ;;  %v1699_v32 = vsel %vm1697_vm4, %v3554_v27, %v2509_v35  ;;  %v1718_v27 = vsel %vm1697_vm4, %v3674_v17, %v2558_v46  ;;  %v2523_v35 = vunpack.i.l.bf16 %v3773_v25 }
  0xac   : > { %2776 = vrot.lane.b32.xlu2 %v2775_v12, %s3132_s5  ;;  %v4906_v12 = vrot.slane %v3722_v57, 1  ;;  %v1698_v31 = vsel %vm1697_vm4, 0.0, %v2508_v1  ;;  %vm681_vm5 = vcmp.le.s32.totalorder %v455_v9, 14 }
  0xad   : > { %2771 = vrot.lane.b32.xlu1 %v2770_v2, %s3132_s5 }
  0xae   : > { %2766 = vrot.lane.b32.xlu0 %v2765_v11, %s3132_s5  ;;  %v2617_v20 = vpop.permute.xlu2 %2616  ;;  %v2519_v11 = vunpack.i.h.bf16 %v3758_v36  ;;  %v1719_v36 = vsel %vm1697_vm4, %v3704_v37, %v2559_v30 }
  0xaf   : > { %v3842_v18 = vpop.permute.xlu1 %2571  ;;  %v2619_v21 = vunpack.i.h.bf16 %v2617_v20  ;;  %v2618_v23 = vunpack.i.l.bf16 %v2617_v20  ;;  %v939_v20 = vsel %vm843_vm0, %v4906_v12, 0.0 }
  0xb0   : > { %v3844_v13 = vpop.permute.xlu0 %2566  ;;  %v2574_v30 = vunpack.i.h.bf16 %v3842_v18  ;;  %v2573_v46 = vunpack.i.l.bf16 %v3842_v18  ;;  %v4986_v18 = vld [vmem:[#allocation27_spill] sm:$0xff] }
  0xb1   : > { %v3854_v42 = vsel %vm1729_vm14, %v1713_v41, %v2619_v21  ;;  %v3857_v10 = vsel %vm1729_vm14, %v1712_v58, %v2618_v23  ;;  %v4979_v58 = vld [vmem:[#allocation7_spill] sm:$0xff] }
  0xb2   : > { %4976 = vst [vmem:[#allocation57_spill] sm:$0xff] %v3857_v10 }
  0xb4   : > { %2791 = vrot.lane.b32.xlu2 %v2790_v45, %s3132_s5  ;;  %v4980_v45 = vld [vmem:[#allocation6_spill] sm:$0xff] }
  0xb5   : > { %2786 = vrot.lane.b32.xlu1 %v2785_v29, %s3132_s5  ;;  %v2524_v29 = vunpack.i.h.bf16 %v3773_v25 }
  0xb6   : > { %2781 = vrot.lane.b32.xlu0 %v2780_v15, %s3132_s5  ;;  %v2632_v34 = vpop.permute.xlu2 %2631  ;;  %v2795_v15 = vpack.i.bf16 %v4980_v45, %v4979_v58  ;;  %v2539_v58 = vunpack.i.h.bf16 %v3784_v39  ;;  %v4993_v39 = vld [vmem:[#allocation44_spill] sm:$0xff] }
  0xb7   : > { %v2634_v22 = vunpack.i.h.bf16 %v2632_v34  ;;  %v2633_v2 = vunpack.i.l.bf16 %v2632_v34  ;;  %v2582_v33 = vpop.permute.xlu1 %2581  ;;  %v3905_v34 = vsel %vm681_vm5, %v939_v20, 0.0  ;;  %v4987_v20 = vld [vmem:[#allocation39_spill] sm:$0xff] }
  0xb8   : > { %v3878_v19 = vpop.permute.xlu0 %1033  ;;  %v2584_v21 = vunpack.i.h.bf16 %v2582_v33  ;;  %v2583_v23 = vunpack.i.l.bf16 %v2582_v33  ;;  %4981 = vst [vmem:[#allocation7_spill] sm:$0xff] %v3905_v34  ;;  %v4984_v33 = vld [vmem:[#allocation38_spill] sm:$0xff] }
  0xb9   : > { %v3888_v63 = vsel %vm1729_vm14, %v1719_v36, %v2634_v22  ;;  %v3891_v41 = vsel %vm1729_vm14, %v1718_v27, %v2633_v2  ;;  %v4982_v22 = vld [vmem:[#allocation12_spill] sm:$0xff]  ;;  %v4983_v2 = vld [vmem:[#allocation50_spill] sm:$0xff]  ;;  %v4985_v36 = vld [vmem:[#allocation41_spill] sm:$0xff] }
  0xba   : > { %4977 = vst [vmem:[#allocation58_spill] sm:$0xff] %v3888_v63  ;;  %v3898_v1 = vsel %vm1729_vm14, %v1698_v31, %v2583_v23  ;;  %v3901_v9 = vsel %vm1729_vm14, %v1699_v32, %v2584_v21  ;;  %2387 = vmatmul.msk.f32.gmra.mxu1 %vm1697_vm4, %v4982_v22  ;;  %v2534_v25 = vunpack.i.h.bf16 %v4983_v2  ;;  %v2533_v31 = vunpack.i.l.bf16 %v4983_v2 }
  0xbb   : > { %4978 = vst [vmem:[#allocation59_spill] sm:$0xff] %v3891_v41  ;;  %v1702_v32 = vsel %vm1697_vm4, %v4984_v33, %v2518_v28  ;;  %v1703_v27 = vsel %vm1697_vm4, %v4985_v36, %v2519_v11  ;;  %v1705_v21 = vsel %vm1697_vm4, %v4987_v20, %v2524_v29  ;;  %v4989_v28 = vld [vmem:[#allocation9_spill] sm:$0xff]  ;;  %v1725_v11 = vsel %vm1697_vm4, %v3751_v3, %v2574_v30  ;;  %v3036_v41 = vld [vmem:[%s3211_s28 + $0x10] sm:$0xff] }
  0xbc   : > { %2806 = vrot.lane.b32.xlu2 %v2805_v40, %s3133_s10  ;;  %v4988_v40 = vld [vmem:[#allocation40_spill] sm:$0xff]  ;;  %v2815_v2 = vpack.i.bf16 %v4989_v28, %v3905_v34  ;;  %v4992_v34 = vld [vmem:[#allocation14_spill] sm:$0xff] }
  0xbd   : > { %2801 = vrot.lane.b32.xlu1 %v4986_v18, %s3134_s11  ;;  %v1704_v23 = vsel %vm1697_vm4, %v4988_v40, %v2523_v35 }
  0xbe   : > { %2796 = vrot.lane.b32.xlu0 %v2795_v15, %s3132_s5  ;;  %v2647_v45 = vpop.permute.xlu2 %2646  ;;  %v1724_v15 = vsel %vm1697_vm4, %v3714_v44, %v2573_v46 }
  0xbf   : > { %v2649_v12 = vunpack.i.h.bf16 %v2647_v45  ;;  %v2648_v18 = vunpack.i.l.bf16 %v2647_v45  ;;  %v2597_v5 = vpop.permute.xlu1 %2596 }
  0xc0   : > { %v2592_v10 = vpop.permute.xlu0 %2591  ;;  %v2599_v0 = vunpack.i.h.bf16 %v2597_v5  ;;  %v2598_v35 = vunpack.i.l.bf16 %v2597_v5  ;;  %v1709_v5 = vsel %vm1697_vm4, %v4993_v39, %v2534_v25 }
  0xc1   : > { %v2594_v29 = vunpack.i.h.bf16 %v2592_v10  ;;  %v2593_v59 = vunpack.i.l.bf16 %v2592_v10  ;;  %v3932_v63 = vsel %vm1729_vm14, %v1725_v11, %v2649_v12  ;;  %v3935_v28 = vsel %vm1729_vm14, %v1724_v15, %v2648_v18  ;;  %v4994_v12 = vld [vmem:[#allocation42_spill] sm:$0xff] }
  0xc2   : > { %4990 = vst [vmem:[#allocation6_spill] sm:$0xff] %v3932_v63  ;;  %v3942_v45 = vsel %vm1729_vm14, %v1705_v21, %v2599_v0  ;;  %v1736_v10 = vsel %vm1729_vm14, %v1704_v23, %v2598_v35  ;;  %2388 = vmatmul.msk.f32.gmra.mxu1 %vm1697_vm4, %v4992_v34  ;;  %v1708_v11 = vsel %vm1697_vm4, %v4994_v12, %v2533_v31  ;;  %v4995_v0 = vld [vmem:[#allocation5_spill] sm:$0xff]  ;;  %v4997_v23 = vld [vmem:[#allocation43_spill] sm:$0xff]  ;;  %v4999_v63 = vld [vmem:[#allocation8_spill] sm:$0xff] }
  0xc3   : > { %4991 = vst [vmem:[#allocation12_spill] sm:$0xff] %v3935_v28  ;;  %v1735_v30 = vsel %vm1729_vm14, %v1703_v27, %v2594_v29  ;;  %v3939_v46 = vsel %vm1729_vm14, %v1702_v32, %v2593_v59  ;;  %v2549_v27 = vunpack.i.h.bf16 %v3718_v8  ;;  %v2548_v59 = vunpack.i.l.bf16 %v3718_v8  ;;  %v4996_v32 = vld [vmem:[#allocation46_spill] sm:$0xff] }
  0xc4   : > { %2816 = vrot.lane.b32.xlu2 %v2815_v2, %s3134_s11  ;;  %v1711_v21 = vsel %vm1697_vm4, %v4996_v32, %v2539_v58  ;;  %v1710_v25 = vsel %vm1697_vm4, %v4997_v23, %v2538_v54  ;;  %v2554_v2 = vunpack.i.h.bf16 %v3807_v49  ;;  %v2553_v8 = vunpack.i.l.bf16 %v3807_v49 }
  0xc5   : > { %1379 = vrot.lane.b32.xlu1 %v3722_v57, %s3132_s5  ;;  %v5002_v49 = vmov 0.0  }
  0xc6   : > { %2811 = vrot.lane.b32.xlu0 %v4995_v0, %s3135_s17  ;;  %v2657_v31 = vpop.permute.xlu2 %2656  ;;  %v4998_v0 = vld [vmem:[#allocation26_spill] sm:$0xff]  ;;  %v2820_v3 = vpack.i.bf16 %v3587_v55, %v5002_v49 }
  0xc7   : > { %v2612_v18 = vpop.permute.xlu1 %2611  ;;  %v2659_v29 = vunpack.i.h.bf16 %v2657_v31  ;;  %v2658_v35 = vunpack.i.l.bf16 %v2657_v31  ;;  %v2830_v57 = vpack.i.bf16 %v4999_v63, %v4998_v0  ;;  %v2825_v31 = vpack.i.bf16 %v3036_v41, %v5002_v49 }
  0xc8   : > { %v2607_v15 = vpop.permute.xlu0 %2606  ;;  %v2614_v58 = vunpack.i.h.bf16 %v2612_v18  ;;  %v2613_v32 = vunpack.i.l.bf16 %v2612_v18 }
  0xc9   : > { %v2609_v28 = vunpack.i.h.bf16 %v2607_v15  ;;  %v2608_v39 = vunpack.i.l.bf16 %v2607_v15  ;;  %v3968_v54 = vsel %vm1761_vm6, %v3898_v1, %v2659_v29  ;;  %v3972_v23 = vsel %vm1761_vm6, %v3898_v1, %v2658_v35  ;;  %v5004_v1 = vld [vmem:[#allocation49_spill] sm:$0xff]  ;;  %v5005_v35 = vld [vmem:[#allocation47_spill] sm:$0xff] }
  0xca   : > { %5000 = vst [vmem:[#allocation50_spill] sm:$0xff] %v3968_v54  ;;  %v3983_v18 = vsel %vm1729_vm14, %v1711_v21, %v2614_v58  ;;  %v1742_v29 = vsel %vm1729_vm14, %v1710_v25, %v2613_v32  ;;  %v5003_v54 = vld [vmem:[#allocation13_spill] sm:$0xff]  ;;  %v1715_v55 = vsel %vm1697_vm4, %v5004_v1, %v2549_v27  ;;  %v1714_v41 = vsel %vm1697_vm4, %v5005_v35, %v2548_v59 }
  0xcb   : > { %5001 = vst [vmem:[#allocation38_spill] sm:$0xff] %v3972_v23  ;;  %v1741_v63 = vsel %vm1729_vm14, %v1709_v5, %v2609_v28  ;;  %v3980_v15 = vsel %vm1729_vm14, %v1708_v11, %v2608_v39  ;;  %2389 = vmatmul.msk.f32.gmra.mxu1 %vm1697_vm4, %v5003_v54  ;;  %v2564_v28 = vunpack.i.h.bf16 %v3746_v61  ;;  %v2563_v39 = vunpack.i.l.bf16 %v3746_v61  ;;  %v5006_v25 = vld [vmem:[#allocation25_spill] sm:$0xff]  ;;  %v3038_v23 = vld [vmem:[%s3211_s28 + $0x98] sm:$0xff] }
  0xcc   : > { %2831 = vrot.lane.b32.xlu2 %v2830_v57, %s3134_s11  ;;  %v1717_v5 = vsel %vm1697_vm4, %v3676_v48, %v2554_v2  ;;  %v1716_v57 = vsel %vm1697_vm4, %v3668_v50, %v2553_v8  ;;  %v2569_v27 = vunpack.i.h.bf16 %v3844_v13  ;;  %v2845_v58 = vpack.i.bf16 %v3360_v60, %v5006_v25  ;;  %v3037_v8 = vld [vmem:[%s3211_s28 + $0x18] sm:$0xff] }
  0xcd   : > { %2826 = vrot.lane.b32.xlu1 %v2825_v31, %s3135_s17  ;;  %v2835_v2 = vpack.i.bf16 %v4984_v33, %v3674_v17  ;;  %v2840_v35 = vpack.i.bf16 %v3037_v8, %v3038_v23  ;;  %v1721_v17 = vsel %vm1697_vm4, %v3711_v53, %v2564_v28  ;;  %v1720_v33 = vsel %vm1697_vm4, %v3702_v16, %v2563_v39  ;;  %v3040_v8 = vld [vmem:[%s3211_s28 + $0xa0] sm:$0xff] }
  0xce   : > { %2821 = vrot.lane.b32.xlu0 %v2820_v3, %s3133_s10  ;;  %v2672_v11 = vpop.permute.xlu2 %2671  ;;  %v2579_v23 = vunpack.i.h.bf16 %v3771_v7 }
  0xcf   : > { %v2627_v32 = vpop.permute.xlu1 %2626  ;;  %v2674_v3 = vunpack.i.h.bf16 %v2672_v11  ;;  %v2673_v21 = vunpack.i.l.bf16 %v2672_v11 }
  0xd0   : > { %v2622_v59 = vpop.permute.xlu0 %2621  ;;  %v2629_v49 = vunpack.i.h.bf16 %v2627_v32  ;;  %v2628_v1 = vunpack.i.l.bf16 %v2627_v32  ;;  %v2568_v32 = vunpack.i.l.bf16 %v3844_v13  ;;  %v1723_v13 = vsel %vm1697_vm4, %v3716_v47, %v2569_v27 }
  0xd1   : > { %v2624_v31 = vunpack.i.h.bf16 %v2622_v59  ;;  %v2623_v61 = vunpack.i.l.bf16 %v2622_v59  ;;  %v4005_v48 = vsel %vm1761_vm6, %v1736_v10, %v2674_v3  ;;  %v4008_v50 = vsel %vm1761_vm6, %v1735_v30, %v2673_v21  ;;  %v5007_v30 = vld [vmem:[#allocation11_spill] sm:$0xff] }
  0xd2   : > { %v4019_v59 = vsel %vm1729_vm14, %v1717_v5, %v2629_v49  ;;  %v1748_v10 = vsel %vm1729_vm14, %v1716_v57, %v2628_v1  ;;  %v1722_v1 = vsel %vm1697_vm4, %v3709_v24, %v2568_v32  ;;  %v5008_v57 = vld [vmem:[#allocation22_spill] sm:$0xff] }
  0xd3   : > { %v1747_v11 = vsel %vm1729_vm14, %v1715_v55, %v2624_v31  ;;  %v4016_v60 = vsel %vm1729_vm14, %v1714_v41, %v2623_v61  ;;  %2390 = vmatmul.msk.f32.gmra.mxu1 %vm1697_vm4, %v5007_v30  ;;  %v2860_v28 = vpack.i.bf16 %v3415_v6, %v5008_v57  ;;  %v2850_v61 = vpack.i.bf16 %v4985_v36, %v3704_v37 }
  0xd4   : > { %2846 = vrot.lane.b32.xlu2 %v2845_v58, %s3134_s11  ;;  %v1727_v37 = vsel %vm1697_vm4, %v3756_v62, %v2579_v23 }
  0xd5   : > { %2841 = vrot.lane.b32.xlu1 %v2840_v35, %s3135_s17 }
  0xd6   : > { %2836 = vrot.lane.b32.xlu0 %v2835_v2, %s3133_s10  ;;  %v2687_v49 = vpop.permute.xlu2 %2686  ;;  %v3039_v2 = vld [vmem:[%s3211_s28 + $0x20] sm:$0xff] }
  0xd7   : > { %v2642_v41 = vpop.permute.xlu1 %2641  ;;  %v2689_v35 = vunpack.i.h.bf16 %v2687_v49  ;;  %v2688_v5 = vunpack.i.l.bf16 %v2687_v49  ;;  %v2855_v32 = vpack.i.bf16 %v3039_v2, %v3040_v8  ;;  %v3042_v2 = vld [vmem:[%s3211_s28 + $0xa8] sm:$0xff] }
  0xd8   : > { %v2637_v55 = vpop.permute.xlu0 %2636  ;;  %v2644_v21 = vunpack.i.h.bf16 %v2642_v41  ;;  %v2643_v58 = vunpack.i.l.bf16 %v2642_v41  ;;  %v2578_v41 = vunpack.i.l.bf16 %v3771_v7  ;;  %v1728_v7 = vsel %vm1697_vm4, %v3754_v51, %v3878_v19 }
  0xd9   : > { %v2639_v3 = vunpack.i.h.bf16 %v2637_v55  ;;  %v2638_v39 = vunpack.i.l.bf16 %v2637_v55  ;;  %v4040_v31 = vsel %vm1761_vm6, %v1742_v29, %v2689_v35  ;;  %v4043_v27 = vsel %vm1761_vm6, %v1741_v63, %v2688_v5  ;;  %v5009_v63 = vld [vmem:[#allocation10_spill] sm:$0xff] }
  0xda   : > { %v4054_v55 = vsel %vm1729_vm14, %v1723_v13, %v2644_v21  ;;  %v1754_v29 = vsel %vm1729_vm14, %v1722_v1, %v2643_v58  ;;  %v2865_v19 = vpack.i.bf16 %v4988_v40, %v3702_v16 }
  0xdb   : > { %v1753_v49 = vsel %vm1729_vm14, %v1721_v17, %v2639_v3  ;;  %v4051_v6 = vsel %vm1729_vm14, %v1720_v33, %v2638_v39  ;;  %2391 = vmatmul.msk.f32.gmra.mxu1 %vm1697_vm4, %v5009_v63  ;;  %v1726_v17 = vsel %vm1697_vm4, %v3749_v56, %v2578_v41  ;;  %v5010_v39 = vld [vmem:[#allocation21_spill] sm:$0xff] }
  0xdc   : > { %2861 = vrot.lane.b32.xlu2 %v2860_v28, %s3134_s11  ;;  %v2875_v23 = vpack.i.bf16 %v4982_v22, %v5010_v39 }
  0xdd   : > { %2856 = vrot.lane.b32.xlu1 %v2855_v32, %s3135_s17 }
  0xde   : > { %2851 = vrot.lane.b32.xlu0 %v2850_v61, %s3133_s10  ;;  %v2702_v36 = vpop.permute.xlu2 %2701  ;;  %v3041_v61 = vld [vmem:[%s3211_s28 + $0x28] sm:$0xff] }
  0xdf   : > { %v1157_v13 = vpop.permute.xlu1 %1156  ;;  %v2704_v1 = vunpack.i.h.bf16 %v2702_v36  ;;  %v2703_v35 = vunpack.i.l.bf16 %v2702_v36  ;;  %v2870_v8 = vpack.i.bf16 %v3041_v61, %v3042_v2  ;;  %v5011_v36 = vld [vmem:[#allocation18_spill] sm:$0xff] }
  0xe0   : > { %v2652_v33 = vpop.permute.xlu0 %2651  ;;  %v4071_v3 = vsel %vm1729_vm14, %v1728_v7, %v1157_v13 }
  0xe1   : > { %v2654_v5 = vunpack.i.h.bf16 %v2652_v33  ;;  %v2653_v28 = vunpack.i.l.bf16 %v2652_v33  ;;  %v4076_v21 = vsel %vm1761_vm6, %v1748_v10, %v2704_v1  ;;  %v4079_v58 = vsel %vm1761_vm6, %v1747_v11, %v2703_v35 }
  0xe3   : > { %v4086_v32 = vsel %vm1729_vm14, %v1726_v17, %v2653_v28  ;;  %v1759_v41 = vsel %vm1729_vm14, %v1727_v37, %v2654_v5  ;;  %2392 = vmatmul.msk.f32.gmra.mxu1 %vm1697_vm4, %v5011_v36  ;;  %v5012_v17 = vld [vmem:[#allocation31_spill] sm:$0xff]  ;;  %v2880_v28 = vpack.i.bf16 %v4987_v20, %v3711_v53 }
  0xe4   : > { %2876 = vrot.lane.b32.xlu2 %v2875_v23, %s3134_s11  ;;  %v2890_v7 = vpack.i.bf16 %v4992_v34, %v5012_v17  ;;  %v3043_v23 = vld [vmem:[%s3211_s28 + $0x30] sm:$0xff] }
  0xe5   : > { %2871 = vrot.lane.b32.xlu1 %v2870_v8, %s3135_s17  ;;  %v5013_v8 = vld [vmem:[#allocation17_spill] sm:$0xff] }
  0xe6   : > { %2866 = vrot.lane.b32.xlu0 %v2865_v19, %s3133_s10  ;;  %v2717_v16 = vpop.permute.xlu2 %2716  ;;  %v3044_v19 = vld [vmem:[%s3211_s28 + $0xb0] sm:$0xff] }
  0xe7   : > { %v2667_v40 = vpop.permute.xlu1 %2666  ;;  %v2719_v11 = vunpack.i.h.bf16 %v2717_v16  ;;  %v2718_v10 = vunpack.i.l.bf16 %v2717_v16  ;;  %v2885_v61 = vpack.i.bf16 %v3043_v23, %v3044_v19 }
  0xe8   : > { %v2662_v22 = vpop.permute.xlu0 %2661  ;;  %v2669_v13 = vunpack.i.h.bf16 %v2667_v40  ;;  %v2668_v1 = vunpack.i.l.bf16 %v2667_v40 }
  0xe9   : > { %v2664_v37 = vunpack.i.h.bf16 %v2662_v22  ;;  %v2663_v33 = vunpack.i.l.bf16 %v2662_v22  ;;  %v4097_v35 = vsel %vm1761_vm6, %v1754_v29, %v2719_v11  ;;  %v4100_v5 = vsel %vm1761_vm6, %v1753_v49, %v2718_v10 }
  0xea   : > { %v1767_v29 = vsel %vm1761_vm6, %v3939_v46, %v2669_v13  ;;  %v1766_v49 = vsel %vm1761_vm6, %v3796_v38, %v2668_v1  ;;  %v5014_v46 = vld [vmem:[#allocation30_spill] sm:$0xff]  ;;  %v2895_v10 = vpack.i.bf16 %v3593_v52, %v3709_v24  ;;  %v5016_v24 = vld [vmem:[#allocation20_spill] sm:$0xff] }
  0xeb   : > { %v4108_v2 = vsel %vm1761_vm6, %v3901_v9, %v2663_v33  ;;  %v4112_v34 = vsel %vm1761_vm6, %v3793_v14, %v2664_v37  ;;  %2393 = vmatmul.msk.f32.gmra.mxu1 %vm1697_vm4, %v5013_v8  ;;  %v2905_v16 = vpack.i.bf16 %v5003_v54, %v5014_v46  ;;  %v3046_v37 = vld [vmem:[%s3211_s28 + $0xb8] sm:$0xff] }
  0xec   : > { %2891 = vrot.lane.b32.xlu2 %v2890_v7, %s3134_s11  ;;  %v3045_v7 = vld [vmem:[%s3211_s28 + $0x38] sm:$0xff] }
  0xed   : > { %2886 = vrot.lane.b32.xlu1 %v2885_v61, %s3135_s17  ;;  %v2900_v33 = vpack.i.bf16 %v3045_v7, %v3046_v37 }
  0xee   : > { %2881 = vrot.lane.b32.xlu0 %v2880_v28, %s3133_s10  ;;  %v4123_v53 = vpop.permute.xlu2 %2731 }
  0xef   : > { %v2682_v9 = vpop.permute.xlu1 %2681  ;;  %v2733_v20 = vunpack.i.l.bf16 %v4123_v53 }
  0xf0   : > { %v2677_v14 = vpop.permute.xlu0 %2676  ;;  %v2684_v40 = vunpack.i.h.bf16 %v2682_v9  ;;  %v2683_v11 = vunpack.i.l.bf16 %v2682_v9 }
  0xf1   : > { %v2679_v38 = vunpack.i.h.bf16 %v2677_v14  ;;  %v2678_v22 = vunpack.i.l.bf16 %v2677_v14  ;;  %v4133_v13 = vsel %vm1761_vm6, %v1759_v41, %v2733_v20  ;;  %v5017_v14 = vld [vmem:[#allocation33_spill] sm:$0xff] }
  0xf2   : > { %5015 = vst [vmem:[#allocation41_spill] sm:$0xff] %v4133_v13  ;;  %v1773_v28 = vsel %vm1761_vm6, %v3980_v15, %v2684_v40  ;;  %v1772_v52 = vsel %vm1761_vm6, %v3822_v26, %v2683_v11  ;;  %v2920_v9 = vpack.i.bf16 %v5007_v30, %v5017_v14  ;;  %v3048_v40 = vld [vmem:[%s3211_s28 + $0xc0] sm:$0xff]  ;;  %v5028_v13 = vld [vmem:[#allocation12_spill] sm:$0xff] }
  0xf3   : > { %v4137_v1 = vsel %vm1761_vm6, %v3825_v4, %v2679_v38  ;;  %v4141_v54 = vsel %vm1761_vm6, %v3942_v45, %v2678_v22  ;;  %2394 = vmatmul.msk.f32.gmra.mxu1 %vm1697_vm4, %v5016_v24  ;;  %v2910_v38 = vpack.i.bf16 %v3624_v43, %v3716_v47  ;;  %v3047_v22 = vld [vmem:[%s3211_s28 + $0x40] sm:$0xff]  ;;  %v5018_v47 = vld [vmem:[#allocation19_spill] sm:$0xff] }
  0xf4   : > { %2906 = vrot.lane.b32.xlu2 %v2905_v16, %s3134_s11  ;;  %v2915_v11 = vpack.i.bf16 %v3047_v22, %v3048_v40  ;;  %v1940_v43 = vld [vmem:[%s4821_s1 + $0x70] sm:$0xff]  ;;  %v3050_v22 = vld [vmem:[%s3211_s28 + $0xc8] sm:$0xff] }
  0xf5   : > { %2901 = vrot.lane.b32.xlu1 %v2900_v33, %s3135_s17  ;;  %v5019_v33 = vld [vmem:[#allocation32_spill] sm:$0xff] }
  0xf6   : > { %2896 = vrot.lane.b32.xlu0 %v2895_v10, %s3133_s10  ;;  %v2747_v4 = vpop.permute.xlu2 %2746 }
  0xf7   : > { %v2697_v41 = vpop.permute.xlu1 %2696  ;;  %v2749_v15 = vunpack.i.h.bf16 %v2747_v4  ;;  %v2748_v23 = vunpack.i.l.bf16 %v2747_v4  ;;  %v2935_v4 = vpack.i.bf16 %v5009_v63, %v5019_v33  ;;  %v2925_v63 = vpack.i.bf16 %v4994_v12, %v3714_v44  ;;  %v5023_v44 = vld [vmem:[#allocation58_spill] sm:$0xff] }
  0xf8   : > { %v4152_v45 = vpop.permute.xlu0 %2691  ;;  %v2699_v19 = vunpack.i.h.bf16 %v2697_v41  ;;  %v2698_v61 = vunpack.i.l.bf16 %v2697_v41  ;;  %v1939_v41 = vld [vmem:[%s4821_s1 + $0x68] sm:$0xff] }
  0xf9   : > { %v2693_v26 = vunpack.i.l.bf16 %v4152_v45  ;;  %v4158_v20 = vsel %vm1794_vm7, %v1767_v29, %v2749_v15  ;;  %v4161_v16 = vsel %vm1794_vm7, %v1766_v49, %v2748_v23  ;;  %v1941_v29 = vld [vmem:[%s4821_s1 + $0x78] sm:$0xff] }
  0xfa   : > { %v4173_v7 = vsel %vm1761_vm6, %v4016_v60, %v2699_v19  ;;  %v4177_v30 = vsel %vm1761_vm6, %v3854_v42, %v2698_v61  ;;  %2422 = vmatpush.msra.mxu2 %v1941_v29  ;;  %2010 = vmatpush.msra.mxu0 %v1941_v29 }
  0xfb   : > { %v4169_v10 = vsel %vm1761_vm6, %v3983_v18, %v2693_v26  ;;  %2395 = vmatmul.msk.f32.gmra.mxu1 %vm1697_vm4, %v5018_v47  ;;  %2423 = vmatpush.msra.mxu3 %v1941_v29  ;;  %v5022_v29 = vld [vmem:[#allocation59_spill] sm:$0xff] }
  0xfc   : > { %2921 = vrot.lane.b32.xlu2 %v2920_v9, %s3134_s11  ;;  %2424 = vmatpush.msra.mxu2 %v1940_v43 }
  0xfd   : > { %2916 = vrot.lane.b32.xlu1 %v2915_v11, %s3135_s17  ;;  %2011 = vmatpush.msra.mxu0 %v1940_v43  ;;  %v1938_v11 = vld [vmem:[%s4821_s1 + $0x60] sm:$0xff] }
  0xfe   : > { %2911 = vrot.lane.b32.xlu0 %v2910_v38, %s3133_s10  ;;  %v2762_v42 = vpop.permute.xlu2 %2761  ;;  %2426 = vmatpush.msra.mxu2 %v1939_v41  ;;  %v3049_v38 = vld [vmem:[%s3211_s28 + $0x48] sm:$0xff] }
  0xff   : > { %v2712_v60 = vpop.permute.xlu1 %2711  ;;  %v2764_v49 = vunpack.i.h.bf16 %v2762_v42  ;;  %v2763_v37 = vunpack.i.l.bf16 %v2762_v42  ;;  %2425 = vmatpush.msra.mxu3 %v1940_v43  ;;  %v2930_v40 = vpack.i.bf16 %v3049_v38, %v3050_v22  ;;  %2012 = vmatpush.msra.mxu0 %v1939_v41  ;;  %v1937_v42 = vld [vmem:[%s4821_s1 + $0x58] sm:$0xff] }
 0x100   : > { %v2707_v18 = vpop.permute.xlu0 %2706  ;;  %v2714_v26 = vunpack.i.h.bf16 %v2712_v60  ;;  %v2713_v19 = vunpack.i.l.bf16 %v2712_v60  ;;  %2428 = vmatpush.msra.mxu2 %v1938_v11  ;;  %v5027_v38 = vld [vmem:[#allocation44_spill] sm:$0xff] }
 0x101   : > { %v2709_v15 = vunpack.i.h.bf16 %v2707_v18  ;;  %v2708_v23 = vunpack.i.l.bf16 %v2707_v18  ;;  %v4196_v61 = vsel %vm1794_vm7, %v1773_v28, %v2764_v49  ;;  %v4199_v9 = vsel %vm1794_vm7, %v1772_v52, %v2763_v37  ;;  %v5024_v18 = vld [vmem:[#allocation16_spill] sm:$0xff]  ;;  %2427 = vmatpush.msra.mxu3 %v1939_v41  ;;  %2013 = vmatpush.msra.mxu0 %v1938_v11  ;;  %v5025_v37 = vld [vmem:[#allocation29_spill] sm:$0xff]  ;;  %v1935_v41 = vld [vmem:[%s4821_s1 + $0x48] sm:$0xff] }
 0x102   : > { %5020 = vst [vmem:[#allocation27_spill] sm:$0xff] %v4196_v61  ;;  %v1785_v52 = vsel %vm1761_vm6, %v4051_v6, %v2714_v26  ;;  %v1784_v12 = vsel %vm1761_vm6, %v5023_v44, %v2713_v19  ;;  %2430 = vmatpush.msra.mxu2 %v1937_v42 }
 0x103   : > { %5021 = vst [vmem:[#allocation39_spill] sm:$0xff] %v4199_v9  ;;  %v4210_v43 = vsel %vm1761_vm6, %v5022_v29, %v2709_v15  ;;  %v4214_v28 = vsel %vm1761_vm6, %v4019_v59, %v2708_v23  ;;  %2396 = vmatmul.msk.f32.gmra.mxu1 %vm1697_vm4, %v5024_v18  ;;  %v1936_v59 = vld [vmem:[%s4821_s1 + $0x50] sm:$0xff]  ;;  %2429 = vmatpush.msra.mxu3 %v1938_v11 }
 0x104   : > { %2936 = vrot.lane.b32.xlu2 %v2935_v4, %s3134_s11  ;;  %2432 = vmatpush.msra.mxu2 %v1936_v59  ;;  %v2950_v4 = vpack.i.bf16 %v5011_v36, %v5025_v37  ;;  %v3052_v29 = vld [vmem:[%s3211_s28 + $0xd0] sm:$0xff]  ;;  %v1934_v36 = vld [vmem:[%s4821_s1 + $0x40] sm:$0xff] }
 0x105   : > { %2931 = vrot.lane.b32.xlu1 %v2930_v40, %s3135_s17  ;;  %2014 = vmatpush.msra.mxu0 %v1937_v42  ;;  %v3051_v40 = vld [vmem:[%s3211_s28 + $0x50] sm:$0xff] }
 0x106   : > { %2926 = vrot.lane.b32.xlu0 %v2925_v63, %s3133_s10  ;;  %v4231_v6 = vpop.permute.xlu2 %2776  ;;  %2434 = vmatpush.msra.mxu2 %v1935_v41  ;;  %v5026_v63 = vld [vmem:[#allocation54_spill] sm:$0xff]  ;;  %v2945_v44 = vpack.i.bf16 %v3051_v40, %v3052_v29  ;;  %v5034_v40 = vld [vmem:[#allocation15_spill] sm:$0xff] }
 0x107   : > { %v2727_v49 = vpop.permute.xlu1 %2726  ;;  %v2940_v22 = vpack.i.bf16 %v5027_v38, %v5026_v63  ;;  %2431 = vmatpush.msra.mxu3 %v1937_v42  ;;  %v5032_v63 = vld [vmem:[#allocation6_spill] sm:$0xff]  ;;  %v1933_v42 = vld [vmem:[%s4821_s1 + $0x38] sm:$0xff]  ;;  %2015 = vmatpush.msra.mxu0 %v1936_v59 }
 0x108   : > { %v2722_v60 = vpop.permute.xlu0 %2721  ;;  %v2729_v26 = vunpack.i.h.bf16 %v2727_v49  ;;  %v2728_v19 = vunpack.i.l.bf16 %v2727_v49  ;;  %2436 = vmatpush.msra.mxu2 %v1934_v36 }
 0x109   : > { %v2724_v15 = vunpack.i.h.bf16 %v2722_v60  ;;  %v2723_v23 = vunpack.i.l.bf16 %v2722_v60  ;;  %2433 = vmatpush.msra.mxu3 %v1936_v59  ;;  %2016 = vmatpush.msra.mxu0 %v1935_v41 }
 0x10a   : > { %v4255_v49 = vsel %vm1761_vm6, %v4086_v32, %v2729_v26  ;;  %v4259_v38 = vsel %vm1761_vm6, %v5032_v63, %v2728_v19  ;;  %2438 = vmatpush.msra.mxu2 %v1933_v42 }
 0x10b   : > { %v4247_v11 = vsel %vm1761_vm6, %v5028_v13, %v2724_v15  ;;  %v4251_v60 = vsel %vm1761_vm6, %v4054_v55, %v2723_v23  ;;  %5031 = vst [vmem:[#allocation14_spill] sm:$0xff] %v4255_v49  ;;  %2397 = vmatmul.msk.f32.gmra.mxu1 %vm1697_vm4, %v5034_v40  ;;  %v1932_v55 = vld [vmem:[%s4821_s1 + $0x30] sm:$0xff]  ;;  %2435 = vmatpush.msra.mxu3 %v1935_v41 }
 0x10c   : > { %5029 = vst [vmem:[#allocation40_spill] sm:$0xff] %v4247_v11  ;;  %2951 = vrot.lane.b32.xlu2 %v2950_v4, %s3134_s11  ;;  %2440 = vmatpush.msra.mxu2 %v1932_v55  ;;  %v1931_v4 = vld [vmem:[%s4821_s1 + $0x28] sm:$0xff]  ;;  %v5035_v49 = vld [vmem:[#allocation43_spill] sm:$0xff]  ;;  %v1930_v11 = vld [vmem:[%s4821_s1 + $0x20] sm:$0xff] }
 0x10d   : > { %5030 = vst [vmem:[#allocation9_spill] sm:$0xff] %v4251_v60  ;;  %2946 = vrot.lane.b32.xlu1 %v2945_v44, %s3135_s17  ;;  %2017 = vmatpush.msra.mxu0 %v1934_v36 }
 0x10e   : > { %5033 = vst [vmem:[#allocation42_spill] sm:$0xff] %v4259_v38  ;;  %2941 = vrot.lane.b32.xlu0 %v2940_v22, %s3133_s10  ;;  %v2792_v32 = vpop.permute.xlu2 %2791  ;;  %v3053_v22 = vld [vmem:[%s3211_s28 + $0xd8] sm:$0xff]  ;;  %2442 = vmatpush.msra.mxu2 %v1931_v4 }
 0x10f   : > { %v4274_v15 = vpop.permute.xlu1 %2741  ;;  %v2794_v23 = vunpack.i.h.bf16 %v2792_v32  ;;  %v2793_v26 = vunpack.i.l.bf16 %v2792_v32  ;;  %v2965_v44 = vpack.i.bf16 %v3053_v22, %v3052_v29  ;;  %v2955_v32 = vpack.i.bf16 %v5035_v49, %v3749_v56  ;;  %v3054_v38 = vld [vmem:[%s3211_s28 + $0x58] sm:$0xff]  ;;  %2437 = vmatpush.msra.mxu3 %v1934_v36  ;;  %2018 = vmatpush.msra.mxu0 %v1933_v42  ;;  %v3055_v49 = vld [vmem:[%s3211_s28 + $0x60] sm:$0xff] }
 0x110   : > { %v4272_v13 = vpop.permute.xlu0 %2736  ;;  %v2744_v19 = vunpack.i.h.bf16 %v4274_v15  ;;  %v2960_v61 = vpack.i.bf16 %v3054_v38, %v3053_v22  ;;  %2444 = vmatpush.msra.mxu2 %v1930_v11  ;;  %v5036_v56 = vld [vmem:[#allocation24_spill] sm:$0xff]  ;;  %v4312_v38 = vld [vmem:[%s3211_s28 + $0xe0] sm:$0xff] }
 0x111   : > { %v4282_v63 = vsel %vm1794_vm7, %v1785_v52, %v2794_v23  ;;  %v4285_v59 = vsel %vm1794_vm7, %v1784_v12, %v2793_v26  ;;  %v1929_v52 = vld [vmem:[%s4821_s1 + $0x18] sm:$0xff]  ;;  %2439 = vmatpush.msra.mxu3 %v1933_v42  ;;  %v2980_v23 = vpack.i.bf16 %v3055_v49, %v4312_v38  ;;  %2019 = vmatpush.msra.mxu0 %v1932_v55  ;;  %v1926_v49 = vld [vmem:[%s4821_s1] sm:$0xff] }
 0x112   : > { %v4295_v41 = vsel %vm1794_vm7, %v4112_v34, %v2744_v19  ;;  %2446 = vmatpush.msra.mxu2 %v1929_v52  ;;  %v1928_v34 = vld [vmem:[%s4821_s1 + $0x10] sm:$0xff] }
 0x113   : > { %2398 = vmatmul.msk.f32.gmra.mxu1 %vm1697_vm4, %v5036_v56  ;;  %2441 = vmatpush.msra.mxu3 %v1932_v55  ;;  %v5038_v56 = vld [vmem:[#allocation46_spill] sm:$0xff] }
 0x114   : > { %2966 = vrot.lane.b32.xlu2 %v2965_v44, %s3132_s5  ;;  %2448 = vmatpush.msra.mxu2 %v1928_v34  ;;  %v2975_v9 = vpack.i.bf16 %v5038_v56, %v3756_v62 }
 0x115   : > { %2961 = vrot.lane.b32.xlu1 %v2960_v61, %s3135_s17  ;;  %v1927_v61 = vld [vmem:[%s4821_s1 + $0x8] sm:$0xff]  ;;  %2020 = vmatpush.msra.mxu0 %v1931_v4 }
 0x116   : > { %2956 = vrot.lane.b32.xlu0 %v2955_v32, %s3133_s10  ;;  %v4308_v12 = vpop.permute.xlu2 %2806  ;;  %v5037_v32 = vld [vmem:[#allocation28_spill] sm:$0xff]  ;;  %2450 = vmatpush.msra.mxu2 %v1927_v61 }
 0x117   : > { %v2757_v36 = vpop.permute.xlu1 %2756  ;;  %v2970_v42 = vpack.i.bf16 %v5013_v8, %v5037_v32  ;;  %2443 = vmatpush.msra.mxu3 %v1931_v4  ;;  %2021 = vmatpush.msra.mxu0 %v1930_v11 }
 0x118   : > { %v2752_v29 = vpop.permute.xlu0 %2751  ;;  %v2759_v22 = vunpack.i.h.bf16 %v2757_v36  ;;  %v2758_v44 = vunpack.i.l.bf16 %v2757_v36  ;;  %2452 = vmatpush.msra.mxu2 %v1926_v49 }
 0x119   : > { %v2754_v26 = vunpack.i.h.bf16 %v2752_v29  ;;  %v2753_v19 = vunpack.i.l.bf16 %v2752_v29  ;;  %2445 = vmatpush.msra.mxu3 %v1930_v11  ;;  %2022 = vmatpush.msra.mxu0 %v1929_v52 }
 0x11a   : > { %v4335_v55 = vsel %vm1794_vm7, %v4137_v1, %v2759_v22  ;;  %v4339_v62 = vsel %vm1794_vm7, %v4141_v54, %v2758_v44  ;;  %v5040_v22 = vld [vmem:[#allocation36_spill] sm:$0xff] }
 0x11b   : > { %v4327_v60 = vsel %vm1794_vm7, %v4008_v50, %v2753_v19  ;;  %v4331_v29 = vsel %vm1794_vm7, %v4005_v48, %v2754_v26  ;;  %v5039_v50 = vld [vmem:[#allocation23_spill] sm:$0xff]  ;;  %v3057_v26 = vld [vmem:[%s3211_s28 + $0x68] sm:$0xff]  ;;  %2447 = vmatpush.msra.mxu3 %v1929_v52  ;;  %v2985_v44 = vpack.i.bf16 %v5016_v24, %v5040_v22  ;;  %2023 = vmatpush.msra.mxu0 %v1928_v34  ;;  %v5044_v52 = vld [vmem:[#allocation48_spill] sm:$0xff] }
 0x11c   : > { %2981 = vrot.lane.b32.xlu2 %v2980_v23, %s3135_s17  ;;  %2399 = vmatmul.msk.f32.gmra.mxu1 %vm1697_vm4, %v5039_v50  ;;  %v3058_v19 = vld [vmem:[%s3211_s28 + $0xe8] sm:$0xff]  ;;  %v5042_v24 = vld [vmem:[#allocation55_spill] sm:$0xff] }
 0x11d   : > { %2976 = vrot.lane.b32.xlu1 %v2975_v9, %s3133_s10  ;;  %v2995_v23 = vpack.i.bf16 %v3057_v26, %v3058_v19  ;;  %v5041_v9 = vld [vmem:[#allocation45_spill] sm:$0xff]  ;;  %2449 = vmatpush.msra.mxu3 %v1928_v34 }
 0x11e   : > { %2971 = vrot.lane.b32.xlu0 %v2970_v42, %s3134_s11  ;;  %v4344_v48 = vpop.permute.xlu2 %2816  ;;  %v2990_v42 = vpack.i.bf16 %v5041_v9, %v3754_v51  ;;  %2024 = vmatpush.msra.mxu0 %v1927_v61 }
 0x11f   : > { %v2772_v1 = vpop.permute.xlu1 %2771  ;;  %2451 = vmatpush.msra.mxu3 %v1927_v61 }
 0x120   : > { %v2767_v8 = vpop.permute.xlu0 %2766  ;;  %v2773_v36 = vunpack.i.l.bf16 %v2772_v1  ;;  %2025 = vmatpush.msra.mxu0 %v1926_v49  ;;  %v4380_v61 = vpop.f32.mrf.mxu1 }
 0x121   : > { %v2769_v54 = vunpack.i.h.bf16 %v2767_v8  ;;  %v2768_v4 = vunpack.i.l.bf16 %v2767_v8  ;;  %2453 = vmatpush.msra.mxu3 %v1926_v49  ;;  %v3000_v8 = vpack.i.bf16 %v3058_v19, %v4312_v38  ;;  %v2694_v38 = vunpack.i.h.bf16 %v4152_v45 }
 0x122   : > { %v4364_v50 = vsel %vm1794_vm7, %v4169_v10, %v2773_v36  ;;  %v5043_v10 = vld [vmem:[#allocation53_spill] sm:$0xff] }
 0x123   : > { %v4356_v11 = vsel %vm1794_vm7, %v4043_v27, %v2768_v4  ;;  %v4360_v56 = vsel %vm1794_vm7, %v4040_v31, %v2769_v54  ;;  %2454 = vmatpush.msrb.mxu3 %v5042_v24  ;;  %v3010_v34 = vpack.i.bf16 %v5044_v52, %v5043_v10  ;;  %v5045_v54 = vld [vmem:[#allocation35_spill] sm:$0xff]  ;;  %v5046_v4 = vld [vmem:[#allocation56_spill] sm:$0xff]  ;;  %v2774_v24 = vunpack.i.h.bf16 %v2772_v1 }
 0x124   : > { %2996 = vrot.lane.b32.xlu2 %v2995_v23, %s3135_s17  ;;  %2400 = vmatmul.msk.f32.gmra.mxu1 %vm1697_vm4, %v4998_v0  ;;  %v3005_v49 = vpack.i.bf16 %v5018_v47, %v5045_v54  ;;  %v5047_v23 = vld [vmem:[#allocation52_spill] sm:$0xff]  ;;  %v3059_v10 = vld [vmem:[%s3211_s28 + $0x70] sm:$0xff]  ;;  %v2808_v1 = vunpack.i.l.bf16 %v4308_v12 }
 0x125   : > { %2991 = vrot.lane.b32.xlu1 %v2990_v42, %s3133_s10  ;;  %2455 = vmatpush.msrb.mxu3 %v5046_v4  ;;  %v3060_v52 = vld [vmem:[%s3211_s28 + $0xf0] sm:$0xff] }
 0x126   : > { %2986 = vrot.lane.b32.xlu0 %v2985_v44, %s3134_s11  ;;  %v4369_v51 = vpop.permute.xlu2 %2831  ;;  %v5048_v44 = vld [vmem:[#allocation47_spill] sm:$0xff] }
 0x127   : > { %v4373_v31 = vpop.permute.xlu1 %2786  ;;  %v3025_v9 = vpack.i.bf16 %v5048_v44, %v5047_v23 }
 0x128   : > { %v4371_v27 = vpop.permute.xlu0 %2781  ;;  %v4396_v42 = vpop.f32.mrf.mxu1 }
 0x12c   : > { %3011 = vrot.lane.b32.xlu2 %v3010_v34, %s3133_s10  ;;  %2401 = vmatmul.msk.f32.gmra.mxu1 %vm1697_vm4, %v5006_v25  ;;  %v3015_v34 = vpack.i.bf16 %v3059_v10, %v3060_v52 }
 0x12d   : > { %3006 = vrot.lane.b32.xlu1 %v3005_v49, %s3134_s11 }
 0x12e   : > { %3001 = vrot.lane.b32.xlu0 %v3000_v8, %s3132_s5  ;;  %v4389_v0 = vpop.permute.xlu2 %2846  ;;  %v5049_v8 = vld [vmem:[#allocation37_spill] sm:$0xff] }
 0x12f   : > { %v2802_v26 = vpop.permute.xlu1 %2801  ;;  %v3020_v49 = vpack.i.bf16 %v5024_v18, %v5049_v8 }
 0x130   : > { %v2797_v36 = vpop.permute.xlu0 %2796  ;;  %v2803_v45 = vunpack.i.l.bf16 %v2802_v26 }
 0x131   : > { %v2799_v19 = vunpack.i.h.bf16 %v2797_v36  ;;  %v2798_v47 = vunpack.i.l.bf16 %v2797_v36  ;;  %v5050_v36 = vld [vmem:[#allocation57_spill] sm:$0xff] }
 0x132   : > { %v1777_v23 = vsel %vm1761_vm6, %v5050_v36, %v2694_v38 }
 0x133   : > { %v4404_v4 = vsel %vm1794_vm7, %v4100_v5, %v2798_v47  ;;  %v4408_v25 = vsel %vm1794_vm7, %v4097_v35, %v2799_v19  ;;  %v1810_v44 = vsel %vm1794_vm7, %v1777_v23, %v2774_v24  ;;  %v5051_v5 = vld [vmem:[#allocation51_spill] sm:$0xff]  ;;  %v5053_v47 = vld [vmem:[#allocation34_spill] sm:$0xff]  ;;  %v2734_v24 = vunpack.i.h.bf16 %v4123_v53 }
 0x134   : > { %3026 = vrot.lane.b32.xlu2 %v3025_v9, %s3133_s10  ;;  %v5052_v18 = vrot.slane %v5051_v5, 1  ;;  %v5054_v35 = vrot.slane %v5053_v47, 1  ;;  %v1843_v38 = vsel %vm1827_vm8, %v1810_v44, %v2803_v45  ;;  %2402 = vmatmul.msk.f32.gmra.mxu1 %vm1697_vm4, %v5008_v57  ;;  %v2778_v5 = vunpack.i.l.bf16 %v4231_v6 }
 0x135   : > { %3021 = vrot.lane.b32.xlu1 %v3020_v49, %s3134_s11  ;;  %v1876_v45 = vsel %vm1860_vm9, %v1843_v38, %v2808_v1  ;;  %v2804_v44 = vunpack.i.h.bf16 %v2802_v26  ;;  %v2738_v47 = vunpack.i.l.bf16 %v4272_v13  ;;  %v1793_v57 = vsel %vm1761_vm6, %v4071_v3, %v2734_v24  ;;  %v3061_v26 = vld [vmem:[%s3211_s28 + $0xf8] sm:$0xff]  ;;  %v5055_v24 = vld [vmem:[#allocation38_spill] sm:$0xff] }
 0x136   : > { %3016 = vrot.lane.b32.xlu0 %v3015_v34, %s3135_s17  ;;  %v4422_v19 = vsel %vm843_vm0, %v5054_v35, %v5052_v18  ;;  %v4424_v10 = vpop.permute.xlu2 %2861  ;;  %v1811_v53 = vsel %vm1794_vm7, %v4177_v30, %v2778_v5  ;;  %v2819_v35 = vunpack.i.h.bf16 %v4344_v48  ;;  %v2818_v1 = vunpack.i.l.bf16 %v4344_v48 }
 0x137   : > { %v1380_v36 = vpop.permute.xlu1 %1379  ;;  %v3030_v49 = vpack.i.bf16 %v5034_v40, %v4422_v19  ;;  %v4432_v23 = vpop.f32.mrf.mxu1  ;;  %v2809_v40 = vunpack.i.h.bf16 %v4308_v12  ;;  %v1844_v3 = vsel %vm1827_vm8, %v1811_v53, %v2804_v44 }
 0x138   : > { %v2812_v9 = vpop.permute.xlu0 %2811 }
 0x139   : > { %v2813_v34 = vunpack.i.l.bf16 %v2812_v9  ;;  %v2814_v38 = vunpack.i.h.bf16 %v2812_v9  ;;  %v1877_v44 = vsel %vm1860_vm9, %v1844_v3, %v2809_v40  ;;  %v3062_v3 = vld [vmem:[%s3211_s28 + $0x78] sm:$0xff] }
 0x13b   : > { %v1909_v18 = vsel %vm1893_vm10, %v1876_v45, %v2813_v34  ;;  %v1826_v34 = vsel %vm1794_vm7, %v1793_v57, %v1380_v36 }
 0x13c   : > { %2071 = vmatmul.f32.vlgmr.msra.gmra.mxu2 %v1909_v18  ;;  %3031 = vrot.lane.b32.xlu2 %v3030_v49, %s3134_s11  ;;  %v1795_v49 = vsel %vm1794_vm7, %v5055_v24, %v2738_v47  ;;  %v1859_v36 = vsel %vm1827_vm8, %v1826_v34, %v2818_v1  ;;  %v1910_v47 = vsel %vm1893_vm10, %v1877_v44, %v2814_v38  ;;  %v2779_v24 = vunpack.i.h.bf16 %v4231_v6  ;;  %v5056_v6 = vld [vmem:[#allocation49_spill] sm:$0xff] }
 0x13d   : > { %1377 = vrot.lane.b32.xlu1 %v3060_v52, %s3132_s5  ;;  %v1828_v18 = vsel %vm1827_vm8, %v1795_v49, %v2819_v35  ;;  %v2739_v1 = vunpack.i.h.bf16 %v4272_v13  ;;  %v2834_v38 = vunpack.i.h.bf16 %v4369_v51  ;;  %v2833_v34 = vunpack.i.l.bf16 %v4369_v51  ;;  %v3063_v13 = vld [vmem:[%s3211_s28 + $0x80] sm:$0xff] }
 0x13e   : > { %1662 = vrot.lane.b32.xlu0 %v3061_v26, %s3135_s17  ;;  %v4461_v9 = vpop.permute.xlu2 %2876  ;;  %v1812_v49 = vsel %vm1794_vm7, %v4173_v7, %v2779_v24  ;;  %v2743_v7 = vunpack.i.l.bf16 %v4274_v15  ;;  %v2783_v24 = vunpack.i.l.bf16 %v4371_v27 }
 0x13f   : > { %v4455_v12 = vpop.permute.xlu1 %2826  ;;  %v4471_v26 = vpop.f32.mrf.mxu1 }
 0x140   : > { %v4453_v30 = vpop.permute.xlu0 %2821  ;;  %v2829_v45 = vunpack.i.h.bf16 %v4455_v12  ;;  %v2828_v52 = vunpack.i.l.bf16 %v4455_v12  ;;  %v1797_v15 = vsel %vm1794_vm7, %v4108_v2, %v2743_v7  ;;  %v2863_v7 = vunpack.i.l.bf16 %v4424_v10 }
 0x141   : > { %v2824_v5 = vunpack.i.h.bf16 %v4453_v30  ;;  %v2823_v48 = vunpack.i.l.bf16 %v4453_v30 }
 0x143   : > { %v1861_v57 = vsel %vm1860_vm9, %v1828_v18, %v2824_v5  ;;  %v1892_v53 = vsel %vm1860_vm9, %v1859_v36, %v2823_v48  ;;  %v5057_v5 = vld [vmem:[#allocation50_spill] sm:$0xff] }
 0x144   : > { %2074 = vmatmul.f32.gmra.mxu2 %v1910_v47  ;;  %v1894_v40 = vsel %vm1893_vm10, %v1861_v57, %v2829_v45  ;;  %v1925_v35 = vsel %vm1893_vm10, %v1892_v53, %v2828_v52  ;;  %1632 = vrot.lane.b32.xlu2 %v3063_v13, %s3135_s17  ;;  %v1796_v45 = vsel %vm1794_vm7, %v5057_v5, %v2739_v1 }
 0x145   : > { %2026 = vmatmul.f32.vlgmr.msra.gmra.mxu0 %v1894_v40  ;;  %2119 = vmatmul.f32.vlgmr.msra.gmra.mxu3 %v1925_v35  ;;  %v1829_v53 = vsel %vm1827_vm8, %v1796_v45, %v2834_v38  ;;  %v1845_v40 = vsel %vm1827_vm8, %v1812_v49, %v2833_v34  ;;  %v2849_v38 = vunpack.i.h.bf16 %v4389_v0  ;;  %v2848_v34 = vunpack.i.l.bf16 %v4389_v0 }
 0x146   : > { %1630 = vrot.lane.b32.xlu0 %v3062_v3, %s3135_s17  ;;  %1539 = vrot.lane.b32.xlu1 %v5056_v6, %s3133_s10  ;;  %v4493_v35 = vpop.permute.xlu2 %2891  ;;  %v1813_v49 = vsel %vm1794_vm7, %v4079_v58, %v2783_v24  ;;  %s161_s10 = sand.u32 1, %s3118_s13  }
 0x147   : > { %v2842_v44 = vpop.permute.xlu1 %2841  ;;  %s2382_s11 = sshll.u32 %s161_s10, 8  ;;  %s2301_s8 = scalar_lea.sflag [#allocation3], %s161_s10 }
 0x148   : > { %v2837_v36 = vpop.permute.xlu0 %2836  ;;  %v2844_v51 = vunpack.i.h.bf16 %v2842_v44  ;;  %v2843_v57 = vunpack.i.l.bf16 %v2842_v44  ;;  %v4501_v5 = vpop.f32.mrf.mxu1  ;;  %s4705_s17 = scalar_lea.vmem [#allocation2], %s2382_s11 }
 0x149   : > { %v2839_v18 = vunpack.i.h.bf16 %v2837_v36  ;;  %v2838_v47 = vunpack.i.l.bf16 %v2837_v36  ;;  %s2313_s16 = sshll.u32 %s4705_s17, 4  ;;  %s2314_s16 = int_to_ptr.vmem [resolvable:$true] %s2313_s16 }
 0x14b   : > { %v1862_v3 = vsel %vm1860_vm9, %v1829_v53, %v2839_v18  ;;  %v1878_v6 = vsel %vm1860_vm9, %v1845_v40, %v2838_v47  ;;  %v1846_v53 = vsel %vm1827_vm8, %v1813_v49, %v2848_v34  ;;  %v2784_v40 = vunpack.i.h.bf16 %v4371_v27 }
 0x14c   : > { %v1895_v1 = vsel %vm1893_vm10, %v1862_v3, %v2844_v51  ;;  %v1911_v13 = vsel %vm1893_vm10, %v1878_v6, %v2843_v57  ;;  %v1830_v57 = vsel %vm1827_vm8, %v1797_v15, %v2849_v38  ;;  %v2864_v6 = vunpack.i.h.bf16 %v4424_v10 }
 0x14d   : > { %2029 = vmatmul.f32.gmra.mxu0 %v1895_v1  ;;  %2077 = vmatmul.f32.gmra.mxu2 %v1911_v13  ;;  %v1814_v27 = vsel %vm1794_vm7, %v4076_v21, %v2784_v40 }
 0x14e   : > { %2403 = vmatmul.msk.f32.vlgmr.msrb.gmra.mxu3 %vm1697_vm4, %v5010_v39  ;;  %v4518_v3 = vpop.permute.xlu2 %2906 }
 0x14f   : > { %v2857_v36 = vpop.permute.xlu1 %2856 }
 0x150   : > { %v2852_v45 = vpop.permute.xlu0 %2851  ;;  %v2859_v47 = vunpack.i.h.bf16 %v2857_v36  ;;  %v2858_v51 = vunpack.i.l.bf16 %v2857_v36  ;;  %v4524_v24 = vpop.f32.mrf.mxu1  ;;  %v1847_v36 = vsel %vm1827_vm8, %v1814_v27, %v2863_v7 }
 0x151   : > { %v2854_v44 = vunpack.i.h.bf16 %v2852_v45  ;;  %v2853_v18 = vunpack.i.l.bf16 %v2852_v45  ;;  %v1831_v45 = vsel %vm1827_vm8, %v4295_v41, %v2864_v6 }
 0x153   : > { %v1863_v0 = vsel %vm1860_vm9, %v1830_v57, %v2854_v44  ;;  %v1879_v39 = vsel %vm1860_vm9, %v1846_v53, %v2853_v18  ;;  %v2788_v44 = vunpack.i.l.bf16 %v4373_v31 }
 0x154   : > { %v1896_v2 = vsel %vm1893_vm10, %v1863_v0, %v2859_v47  ;;  %v1912_v58 = vsel %vm1893_vm10, %v1879_v39, %v2858_v51  ;;  %v2879_v47 = vunpack.i.h.bf16 %v4461_v9  ;;  %v2878_v51 = vunpack.i.l.bf16 %v4461_v9 }
 0x155   : > { %2032 = vmatmul.f32.gmra.mxu0 %v1896_v2  ;;  %2080 = vmatmul.f32.gmra.mxu2 %v1912_v58  ;;  %v1815_v57 = vsel %vm1794_vm7, %v4214_v28, %v2788_v44 }
 0x156   : > { %2404 = vmatmul.msk.f32.gmra.mxu3 %vm1697_vm4, %v5012_v17  ;;  %v4540_v41 = vpop.permute.xlu2 %2921  ;;  %v1832_v7 = vsel %vm1827_vm8, %v4161_v16, %v2879_v47  ;;  %v1848_v9 = vsel %vm1827_vm8, %v1815_v57, %v2878_v51  ;;  %v2909_v51 = vunpack.i.h.bf16 %v4518_v3  ;;  %v2908_v57 = vunpack.i.l.bf16 %v4518_v3 }
 0x157   : > { %v2872_v13 = vpop.permute.xlu1 %2871 }
 0x158   : > { %v2867_v1 = vpop.permute.xlu0 %2866  ;;  %v2874_v15 = vunpack.i.h.bf16 %v2872_v13  ;;  %v2873_v49 = vunpack.i.l.bf16 %v2872_v13  ;;  %v4544_v6 = vpop.f32.mrf.mxu1 }
 0x159   : > { %v2869_v38 = vunpack.i.h.bf16 %v2867_v1  ;;  %v2868_v34 = vunpack.i.l.bf16 %v2867_v1  ;;  %v2789_v1 = vunpack.i.h.bf16 %v4373_v31 }
 0x15b   : > { %v1864_v10 = vsel %vm1860_vm9, %v1831_v45, %v2869_v38  ;;  %v1880_v17 = vsel %vm1860_vm9, %v1847_v36, %v2868_v34  ;;  %v2894_v38 = vunpack.i.h.bf16 %v4493_v35  ;;  %v2893_v34 = vunpack.i.l.bf16 %v4493_v35 }
 0x15c   : > { %v1897_v18 = vsel %vm1893_vm10, %v1864_v10, %v2874_v15  ;;  %v1913_v21 = vsel %vm1893_vm10, %v1880_v17, %v2873_v49  ;;  %v1816_v16 = vsel %vm1794_vm7, %v4210_v43, %v2789_v1 }
 0x15d   : > { %2035 = vmatmul.f32.gmra.mxu0 %v1897_v18  ;;  %2083 = vmatmul.f32.gmra.mxu2 %v1913_v21  ;;  %v1833_v44 = vsel %vm1827_vm8, %v4158_v20, %v2894_v38  ;;  %v1849_v18 = vsel %vm1827_vm8, %v1816_v16, %v2893_v34 }
 0x15e   : > { %2405 = vmatmul.msk.f32.gmra.mxu3 %vm1697_vm4, %v5014_v46  ;;  %v4560_v45 = vpop.permute.xlu2 %2936 }
 0x15f   : > { %v2887_v0 = vpop.permute.xlu1 %2886 }
 0x160   : > { %v2882_v53 = vpop.permute.xlu0 %2881  ;;  %v2889_v2 = vunpack.i.h.bf16 %v2887_v0  ;;  %v2888_v58 = vunpack.i.l.bf16 %v2887_v0  ;;  %v4567_v21 = vpop.f32.mrf.mxu1 }
 0x161   : > { %v2884_v39 = vunpack.i.h.bf16 %v2882_v53  ;;  %v2883_v40 = vunpack.i.l.bf16 %v2882_v53 }
 0x163   : > { %v1865_v46 = vsel %vm1860_vm9, %v1832_v7, %v2884_v39  ;;  %v1881_v27 = vsel %vm1860_vm9, %v1848_v9, %v2883_v40  ;;  %v1850_v7 = vsel %vm1827_vm8, %v4285_v59, %v2908_v57 }
 0x164   : > { %v1898_v28 = vsel %vm1893_vm10, %v1865_v46, %v2889_v2  ;;  %v1914_v13 = vsel %vm1893_vm10, %v1881_v27, %v2888_v58  ;;  %v1834_v58 = vsel %vm1827_vm8, %v4327_v60, %v2909_v51  ;;  %v2923_v60 = vunpack.i.l.bf16 %v4540_v41 }
 0x165   : > { %2038 = vmatmul.f32.gmra.mxu0 %v1898_v28  ;;  %2086 = vmatmul.f32.gmra.mxu2 %v1914_v13  ;;  %v2924_v28 = vunpack.i.h.bf16 %v4540_v41 }
 0x166   : > { %2406 = vmatmul.msk.f32.gmra.mxu3 %vm1697_vm4, %v5017_v14  ;;  %v2952_v9 = vpop.permute.xlu2 %2951 }
 0x167   : > { %v2902_v49 = vpop.permute.xlu1 %2901 }
 0x168   : > { %v2897_v15 = vpop.permute.xlu0 %2896  ;;  %v2904_v10 = vunpack.i.h.bf16 %v2902_v49  ;;  %v2903_v17 = vunpack.i.l.bf16 %v2902_v49  ;;  %v4583_v1 = vpop.f32.mrf.mxu1  ;;  %v1835_v49 = vsel %vm1827_vm8, %v4331_v29, %v2924_v28 }
 0x169   : > { %v2899_v31 = vunpack.i.h.bf16 %v2897_v15  ;;  %v2898_v36 = vunpack.i.l.bf16 %v2897_v15 }
 0x16b   : > { %v1866_v35 = vsel %vm1860_vm9, %v1833_v44, %v2899_v31  ;;  %v1882_v14 = vsel %vm1860_vm9, %v1849_v18, %v2898_v36  ;;  %v1851_v31 = vsel %vm1827_vm8, %v4282_v63, %v2923_v60  ;;  %v2939_v44 = vunpack.i.h.bf16 %v4560_v45 }
 0x16c   : > { %v1899_v43 = vsel %vm1893_vm10, %v1866_v35, %v2904_v10  ;;  %v1915_v47 = vsel %vm1893_vm10, %v1882_v14, %v2903_v17  ;;  %v2938_v18 = vunpack.i.l.bf16 %v4560_v45 }
 0x16d   : > { %2041 = vmatmul.f32.gmra.mxu0 %v1899_v43  ;;  %2089 = vmatmul.f32.gmra.mxu2 %v1915_v47  ;;  %v1836_v57 = vsel %vm1827_vm8, %v4339_v62, %v2939_v44 }
 0x16e   : > { %2407 = vmatmul.msk.f32.gmra.mxu3 %vm1697_vm4, %v5019_v33  ;;  %v4597_v17 = vpop.permute.xlu2 %2966 }
 0x16f   : > { %v2917_v53 = vpop.permute.xlu1 %2916 }
 0x170   : > { %v2912_v20 = vpop.permute.xlu0 %2911  ;;  %v2919_v40 = vunpack.i.h.bf16 %v2917_v53  ;;  %v2918_v2 = vunpack.i.l.bf16 %v2917_v53  ;;  %v4603_v63 = vpop.f32.mrf.mxu1 }
 0x171   : > { %v2914_v0 = vunpack.i.h.bf16 %v2912_v20  ;;  %v2913_v39 = vunpack.i.l.bf16 %v2912_v20  ;;  %v1852_v20 = vsel %vm1827_vm8, %v4404_v4, %v2938_v18 }
 0x173   : > { %v1867_v46 = vsel %vm1860_vm9, %v1834_v58, %v2914_v0  ;;  %v1883_v3 = vsel %vm1860_vm9, %v1850_v7, %v2913_v39  ;;  %v2954_v39 = vunpack.i.h.bf16 %v2952_v9 }
 0x174   : > { %v1900_v27 = vsel %vm1893_vm10, %v1867_v46, %v2919_v40  ;;  %v1916_v33 = vsel %vm1893_vm10, %v1883_v3, %v2918_v2  ;;  %v2953_v40 = vunpack.i.l.bf16 %v2952_v9 }
 0x175   : > { %2044 = vmatmul.f32.gmra.mxu0 %v1900_v27  ;;  %2092 = vmatmul.f32.gmra.mxu2 %v1916_v33  ;;  %v1837_v33 = vsel %vm1827_vm8, %v4335_v55, %v2954_v39 }
 0x176   : > { %2408 = vmatmul.msk.f32.gmra.mxu3 %vm1697_vm4, %v5025_v37  ;;  %v2982_v2 = vpop.permute.xlu2 %2981  ;;  %v1853_v28 = vsel %vm1827_vm8, %v4408_v25, %v2953_v40  ;;  %v5060_v40 = vld [vmem:[#allocation40_spill] sm:$0xff] }
 0x177   : > { %v2932_v13 = vpop.permute.xlu1 %2931  ;;  %v2983_v55 = vunpack.i.l.bf16 %v2982_v2 }
 0x178   : > { %v2927_v59 = vpop.permute.xlu0 %2926  ;;  %v2934_v16 = vunpack.i.h.bf16 %v2932_v13  ;;  %v2933_v15 = vunpack.i.l.bf16 %v2932_v13  ;;  %v4615_v27 = vpop.f32.mrf.mxu1  ;;  %v2968_v13 = vunpack.i.l.bf16 %v4597_v17 }
 0x179   : > { %v2929_v38 = vunpack.i.h.bf16 %v2927_v59  ;;  %v2928_v34 = vunpack.i.l.bf16 %v2927_v59 }
 0x17b   : > { %v1868_v36 = vsel %vm1860_vm9, %v1835_v49, %v2929_v38  ;;  %v1884_v10 = vsel %vm1860_vm9, %v1851_v31, %v2928_v34  ;;  %v2984_v38 = vunpack.i.h.bf16 %v2982_v2 }
 0x17c   : > { %v1901_v41 = vsel %vm1893_vm10, %v1868_v36, %v2934_v16  ;;  %v1917_v37 = vsel %vm1893_vm10, %v1884_v10, %v2933_v15  ;;  %v5058_v10 = vld [vmem:[#allocation9_spill] sm:$0xff] }
 0x17d   : > { %2047 = vmatmul.f32.gmra.mxu0 %v1901_v41  ;;  %2095 = vmatmul.f32.gmra.mxu2 %v1917_v37  ;;  %v1821_v41 = vsel %vm1794_vm7, %v5058_v10, %v2968_v13  ;;  %v5059_v37 = vld [vmem:[#allocation39_spill] sm:$0xff]  ;;  %v5062_v13 = vld [vmem:[#allocation42_spill] sm:$0xff] }
 0x17e   : > { %2409 = vmatmul.msk.f32.gmra.mxu3 %vm1697_vm4, %v5037_v32  ;;  %v2997_v25 = vpop.permute.xlu2 %2996 }
 0x17f   : > { %v2947_v35 = vpop.permute.xlu1 %2946 }
 0x180   : > { %v2942_v29 = vpop.permute.xlu0 %2941  ;;  %v2949_v47 = vunpack.i.h.bf16 %v2947_v35  ;;  %v2948_v51 = vunpack.i.l.bf16 %v2947_v35 }
 0x181   : > { %v2944_v14 = vunpack.i.h.bf16 %v2942_v29  ;;  %v2943_v43 = vunpack.i.l.bf16 %v2942_v29  ;;  %v4633_v29 = vpop.f32.mrf.mxu1 }
 0x183   : > { %v1869_v53 = vsel %vm1860_vm9, %v1836_v57, %v2944_v14  ;;  %v1885_v45 = vsel %vm1860_vm9, %v1852_v20, %v2943_v43  ;;  %v2998_v57 = vunpack.i.l.bf16 %v2997_v25 }
 0x184   : > { %v1902_v32 = vsel %vm1893_vm10, %v1869_v53, %v2949_v47  ;;  %v1918_v0 = vsel %vm1893_vm10, %v1885_v45, %v2948_v51  ;;  %v2969_v47 = vunpack.i.h.bf16 %v4597_v17  ;;  %v2999_v51 = vunpack.i.h.bf16 %v2997_v25  ;;  %v5063_v25 = vld [vmem:[#allocation7_spill] sm:$0xff] }
 0x185   : > { %2050 = vmatmul.f32.gmra.mxu0 %v1902_v32  ;;  %2098 = vmatmul.f32.gmra.mxu2 %v1918_v0 }
 0x186   : > { %2410 = vmatmul.msk.f32.gmra.mxu3 %vm1697_vm4, %v5040_v22  ;;  %v1822_v2 = vsel %vm1794_vm7, %v5060_v40, %v2969_v47 }
 0x187   : > { %v2962_v58 = vpop.permute.xlu1 %2961 }
 0x188   : > { %v2957_v62 = vpop.permute.xlu0 %2956  ;;  %v2964_v46 = vunpack.i.h.bf16 %v2962_v58  ;;  %v2963_v3 = vunpack.i.l.bf16 %v2962_v58  ;;  %v5061_v58 = vld [vmem:[#allocation27_spill] sm:$0xff] }
 0x189   : > { %v2959_v7 = vunpack.i.h.bf16 %v2957_v62  ;;  %v2958_v4 = vunpack.i.l.bf16 %v2957_v62  ;;  %v3012_v62 = vpop.permute.xlu2 %3011 }
 0x18b   : > { %v1870_v9 = vsel %vm1860_vm9, %v1837_v33, %v2959_v7  ;;  %v1886_v60 = vsel %vm1860_vm9, %v1853_v28, %v2958_v4  ;;  %v4651_v33 = vpop.f32.mrf.mxu1 }
 0x18c   : > { %v1903_v22 = vsel %vm1893_vm10, %v1870_v9, %v2964_v46  ;;  %v1919_v59 = vsel %vm1893_vm10, %v1886_v60, %v2963_v3 }
 0x18d   : > { %2053 = vmatmul.f32.gmra.mxu0 %v1903_v22  ;;  %2101 = vmatmul.f32.gmra.mxu2 %v1919_v59 }
 0x18e   : > { %2411 = vmatmul.msk.f32.gmra.mxu3 %vm1697_vm4, %v5045_v54 }
 0x18f   : > { %v2977_v16 = vpop.permute.xlu1 %2976 }
 0x190   : > { %v2972_v34 = vpop.permute.xlu0 %2971  ;;  %v2979_v31 = vunpack.i.h.bf16 %v2977_v16  ;;  %v2978_v36 = vunpack.i.l.bf16 %v2977_v16  ;;  %v3013_v16 = vunpack.i.l.bf16 %v3012_v62 }
 0x191   : > { %v2974_v15 = vunpack.i.h.bf16 %v2972_v34  ;;  %v2973_v49 = vunpack.i.l.bf16 %v2972_v34  ;;  %v3014_v34 = vunpack.i.h.bf16 %v3012_v62 }
 0x193   : > { %v1838_v44 = vsel %vm1827_vm8, %v5059_v37, %v2974_v15  ;;  %v1854_v18 = vsel %vm1827_vm8, %v1821_v41, %v2973_v49  ;;  %v4662_v49 = vpop.f32.mrf.mxu1 }
 0x194   : > { %v1871_v54 = vsel %vm1860_vm9, %v1838_v44, %v2979_v31  ;;  %v1887_v35 = vsel %vm1860_vm9, %v1854_v18, %v2978_v36 }
 0x195   : > { %v1904_v14 = vsel %vm1893_vm10, %v1871_v54, %v2984_v38  ;;  %v1920_v43 = vsel %vm1893_vm10, %v1887_v35, %v2983_v55  ;;  %v3027_v55 = vpop.permute.xlu2 %3026 }
 0x196   : > { %2412 = vmatmul.msk.f32.gmra.mxu3 %vm1697_vm4, %v5049_v8  ;;  %2056 = vmatmul.f32.gmra.mxu0 %v1904_v14 }
 0x197   : > { %2104 = vmatmul.f32.gmra.mxu2 %v1920_v43  ;;  %v2992_v53 = vpop.permute.xlu1 %2991  ;;  %v5064_v43 = vld [vmem:[#allocation14_spill] sm:$0xff] }
 0x198   : > { %v2987_v20 = vpop.permute.xlu0 %2986  ;;  %v2994_v0 = vunpack.i.h.bf16 %v2992_v53  ;;  %v2993_v39 = vunpack.i.l.bf16 %v2992_v53 }
 0x199   : > { %v2989_v45 = vunpack.i.h.bf16 %v2987_v20  ;;  %v2988_v32 = vunpack.i.l.bf16 %v2987_v20 }
 0x19b   : > { %v1839_v17 = vsel %vm1827_vm8, %v5061_v58, %v2989_v45  ;;  %v1855_v7 = vsel %vm1827_vm8, %v1822_v2, %v2988_v32  ;;  %v4675_v62 = vpop.f32.mrf.mxu1 }
 0x19c   : > { %v1872_v8 = vsel %vm1860_vm9, %v1839_v17, %v2994_v0  ;;  %v1888_v4 = vsel %vm1860_vm9, %v1855_v7, %v2993_v39  ;;  %v5066_v39 = vld [vmem:[#allocation41_spill] sm:$0xff]  ;;  %v3029_v17 = vunpack.i.h.bf16 %v3027_v55 }
 0x19d   : > { %v1905_v46 = vsel %vm1893_vm10, %v1872_v8, %v2999_v51  ;;  %v1921_v3 = vsel %vm1893_vm10, %v1888_v4, %v2998_v57  ;;  %v5065_v51 = vmov 0.0   ;;  %v3032_v57 = vpop.permute.xlu2 %3031 }
 0x19e   : > { %2413 = vmatmul.msk.f32.gmra.mxu3 %vm1697_vm4, %v4422_v19  ;;  %2059 = vmatmul.f32.gmra.mxu0 %v1905_v46  ;;  %v3033_v32 = vunpack.i.l.bf16 %v3032_v57 }
 0x19f   : > { %2107 = vmatmul.f32.gmra.mxu2 %v1921_v3  ;;  %v3007_v9 = vpop.permute.xlu1 %3006 }
 0x1a0   : > { %v3002_v28 = vpop.permute.xlu0 %3001  ;;  %v3009_v22 = vunpack.i.h.bf16 %v3007_v9  ;;  %v3008_v59 = vunpack.i.l.bf16 %v3007_v9 }
 0x1a1   : > { %v3003_v60 = vunpack.i.l.bf16 %v3002_v28  ;;  %v3004_v37 = vunpack.i.h.bf16 %v3002_v28  ;;  %v3034_v28 = vunpack.i.h.bf16 %v3032_v57 }
 0x1a2   : > { %v1840_v15 = vsel %vm1827_vm8, %v4356_v11, %v3009_v22  ;;  %v3028_v11 = vunpack.i.l.bf16 %v3027_v55 }
 0x1a3   : > { %v1823_v38 = vsel %vm1794_vm7, %v5062_v13, %v3003_v60  ;;  %v1873_v44 = vsel %vm1860_vm9, %v1840_v15, %v3014_v34  ;;  %v1824_v47 = vsel %vm1794_vm7, %v5064_v43, %v3004_v37  ;;  %v1842_v30 = vsel %vm1827_vm8, %v4364_v50, %v3034_v28 }
 0x1a4   : > { %v1856_v19 = vsel %vm1827_vm8, %v1823_v38, %v3008_v59  ;;  %v2185_v59 = vpop.f32.mrf.mxu1 }
 0x1a5   : > { %v1889_v18 = vsel %vm1860_vm9, %v1856_v19, %v3013_v16  ;;  %v1633_v13 = vpop.permute.xlu2 %1632 }
 0x1a6   : > { %2414 = vmatmul.msk.f32.gmra.mxu3 %vm1697_vm4, %v5063_v25 }
 0x1a7   : > { %v3022_v36 = vpop.permute.xlu1 %3021 }
 0x1a8   : > { %v3017_v31 = vpop.permute.xlu0 %3016  ;;  %v3023_v54 = vunpack.i.l.bf16 %v3022_v36  ;;  %v3024_v0 = vunpack.i.h.bf16 %v3022_v36 }
 0x1a9   : > { %v3019_v10 = vunpack.i.h.bf16 %v3017_v31  ;;  %v3018_v41 = vunpack.i.l.bf16 %v3017_v31 }
 0x1aa   : > { %v1857_v20 = vsel %vm1827_vm8, %v1824_v47, %v3023_v54  ;;  %v1841_v8 = vsel %vm1827_vm8, %v4360_v56, %v3024_v0  ;;  %v4693_v56 = vld [vmem:[%s4822_s2] ss:$0 sm:$0xff] }
 0x1ab   : > { %v1906_v35 = vsel %vm1893_vm10, %v1873_v44, %v3019_v10  ;;  %v1922_v14 = vsel %vm1893_vm10, %v1889_v18, %v3018_v41  ;;  %v1890_v2 = vsel %vm1860_vm9, %v1857_v20, %v3028_v11  ;;  %v1874_v46 = vsel %vm1860_vm9, %v1841_v8, %v3029_v17 }
 0x1ac   : > { %2062 = vmatmul.f32.gmra.mxu0 %v1906_v35  ;;  %2110 = vmatmul.f32.gmra.mxu2 %v1922_v14  ;;  %v2188_v50 = vpop.f32.mrf.mxu1 }
 0x1ae   : > { %2229 = vmatmul.f32.gmra.mxu3 %v5065_v51 }
 0x1af   : > { %v1378_v45 = vpop.permute.xlu1 %1377 }
 0x1b0   : > { %v1663_v53 = vpop.permute.xlu0 %1662  ;;  %v1825_v40 = vsel %vm1794_vm7, %v5066_v39, %v1378_v45 }
 0x1b1   : > { %v1923_v58 = vsel %vm1893_vm10, %v1890_v2, %v1663_v53  ;;  %v1858_v7 = vsel %vm1827_vm8, %v1825_v40, %v3033_v32 }
 0x1b2   : > { %v1891_v3 = vsel %vm1860_vm9, %v1858_v7, %v2823_v48 }
 0x1b3   : > { %v1924_v22 = vsel %vm1893_vm10, %v1891_v3, %v2828_v52 }
 0x1b4   : > { %2113 = vmatmul.f32.gmra.mxu2 %v1923_v58  ;;  %v2191_v14 = vpop.f32.mrf.mxu1 }
 0x1b6   : > { %2232 = vmatmul.f32.gmra.mxu3 %v5065_v51 }
 0x1b8   : > { %v1631_v4 = vpop.permute.xlu0 %1630  ;;  %v1540_v60 = vpop.permute.xlu1 %1539 }
 0x1b9   : > { %v1907_v9 = vsel %vm1893_vm10, %v1874_v46, %v1631_v4  ;;  %v1875_v48 = vsel %vm1860_vm9, %v1842_v30, %v1540_v60 }
 0x1ba   : > { %2065 = vmatmul.f32.gmra.mxu0 %v1907_v9  ;;  %v1908_v12 = vsel %vm1893_vm10, %v1875_v48, %v1633_v13 }
 0x1bc   : > { %2116 = vmatmul.f32.gmra.mxu2 %v1924_v22 }
 0x1bf   : > { %v2072_v38 = vpop.f32.mrf.mxu2 }
 0x1c0   : > { %v2073_v55 = vadd.f32 %v4693_v56, %v2072_v38 }
 0x1c2   : > { %v2186_v52 = vadd.f32 %v2185_v59, %v2073_v55  ;;  %v2027_v34 = vpop.f32.mrf.mxu0  ;;  %2068 = vmatmul.f32.gmra.mxu0 %v1908_v12 }
 0x1c3   : > { %v2028_v16 = vadd.f32 %v4693_v56, %v2027_v34 }
 0x1c4   : > { %v2251_v25 = vmax.f32 %v2186_v52, 0.0 }
 0x1c5   : > { %v2141_v15 = vadd.f32 %v4380_v61, %v2028_v16 }
 0x1c6   : > { %2283 = vst [vmem:[%s4705_s17 + $0x78] sm:$0xff] %v2251_v25 }
 0x1c7   : > { %v2236_v19 = vmax.f32 %v2141_v15, 0.0  ;;  %v2075_v31 = vpop.f32.mrf.mxu2 }
 0x1c8   : > { %v2076_v36 = vadd.f32 %v4693_v56, %v2075_v31  ;;  %v4709_v10 = vpop.f32.mrf.mxu3 }
 0x1c9   : > { %2268 = vst [vmem:[%s4705_s17] sm:$0xff] %v2236_v19 }
 0x1ca   : > { %v2189_v41 = vadd.f32 %v2188_v50, %v2076_v36  ;;  %v2030_v37 = vpop.f32.mrf.mxu0 }
 0x1cb   : > { %v2031_v44 = vadd.f32 %v4693_v56, %v2030_v37 }
 0x1cc   : > { %v2252_v61 = vmax.f32 %v2189_v41, 0.0 }
 0x1cd   : > { %v2144_v18 = vadd.f32 %v4396_v42, %v2031_v44 }
 0x1ce   : > { %2284 = vst [vmem:[%s4705_s17 + $0x80] sm:$0xff] %v2252_v61 }
 0x1cf   : > { %v2237_v54 = vmax.f32 %v2144_v18, 0.0 }
 0x1d0   : > { %v2078_v35 = vpop.f32.mrf.mxu2 }
 0x1d1   : > { %2269 = vst [vmem:[%s4705_s17 + $0x8] sm:$0xff] %v2237_v54  ;;  %v2079_v11 = vadd.f32 %v4693_v56, %v2078_v35  ;;  %v2194_v43 = vpop.f32.mrf.mxu3 }
 0x1d2   : > { %v2033_v47 = vpop.f32.mrf.mxu0 }
 0x1d3   : > { %v2034_v51 = vadd.f32 %v4693_v56, %v2033_v47  ;;  %v2192_v57 = vadd.f32 %v2191_v14, %v2079_v11 }
 0x1d5   : > { %v2147_v20 = vadd.f32 %v4432_v23, %v2034_v51  ;;  %v2253_v53 = vmax.f32 %v2192_v57, 0.0 }
 0x1d7   : > { %v2238_v45 = vmax.f32 %v2147_v20, 0.0  ;;  %2285 = vst [vmem:[%s4705_s17 + $0x88] sm:$0xff] %v2253_v53 }
 0x1d8   : > { %v2081_v42 = vpop.f32.mrf.mxu2 }
 0x1d9   : > { %2270 = vst [vmem:[%s4705_s17 + $0x10] sm:$0xff] %v2238_v45  ;;  %v2082_v32 = vadd.f32 %v4693_v56, %v2081_v42  ;;  %v2197_v0 = vpop.f32.mrf.mxu3 }
 0x1da   : > { %v2036_v39 = vpop.f32.mrf.mxu0 }
 0x1db   : > { %v2195_v40 = vadd.f32 %v2194_v43, %v2082_v32  ;;  %v2037_v2 = vadd.f32 %v4693_v56, %v2036_v39 }
 0x1dd   : > { %v2254_v58 = vmax.f32 %v2195_v40, 0.0  ;;  %v2150_v17 = vadd.f32 %v4471_v26, %v2037_v2 }
 0x1df   : > { %2286 = vst [vmem:[%s4705_s17 + $0x90] sm:$0xff] %v2254_v58  ;;  %v2239_v23 = vmax.f32 %v2150_v17, 0.0 }
 0x1e0   : > { %v2084_v7 = vpop.f32.mrf.mxu2 }
 0x1e1   : > { %2271 = vst [vmem:[%s4705_s17 + $0x18] sm:$0xff] %v2239_v23  ;;  %v2085_v8 = vadd.f32 %v4693_v56, %v2084_v7  ;;  %v2200_v4 = vpop.f32.mrf.mxu3 }
 0x1e2   : > { %v2039_v46 = vpop.f32.mrf.mxu0 }
 0x1e3   : > { %v2198_v3 = vadd.f32 %v2197_v0, %v2085_v8  ;;  %v2040_v28 = vadd.f32 %v4693_v56, %v2039_v46 }
 0x1e5   : > { %v2255_v9 = vmax.f32 %v2198_v3, 0.0  ;;  %v2153_v60 = vadd.f32 %v4501_v5, %v2040_v28 }
 0x1e7   : > { %2287 = vst [vmem:[%s4705_s17 + $0x98] sm:$0xff] %v2255_v9  ;;  %v2240_v22 = vmax.f32 %v2153_v60, 0.0 }
 0x1e8   : > { %v2087_v59 = vpop.f32.mrf.mxu2 }
 0x1e9   : > { %2272 = vst [vmem:[%s4705_s17 + $0x20] sm:$0xff] %v2240_v22  ;;  %v2088_v26 = vadd.f32 %v4693_v56, %v2087_v59  ;;  %v2203_v30 = vpop.f32.mrf.mxu3 }
 0x1ea   : > { %v2042_v48 = vpop.f32.mrf.mxu0 }
 0x1eb   : > { %v2201_v13 = vadd.f32 %v2200_v4, %v2088_v26  ;;  %v2043_v38 = vadd.f32 %v4693_v56, %v2042_v48 }
 0x1ed   : > { %v2256_v55 = vmax.f32 %v2201_v13, 0.0  ;;  %v2156_v12 = vadd.f32 %v4524_v24, %v2043_v38 }
 0x1ef   : > { %2288 = vst [vmem:[%s4705_s17 + $0xa0] sm:$0xff] %v2256_v55  ;;  %v2241_v52 = vmax.f32 %v2156_v12, 0.0 }
 0x1f0   : > { %v2090_v34 = vpop.f32.mrf.mxu2 }
 0x1f1   : > { %2273 = vst [vmem:[%s4705_s17 + $0x28] sm:$0xff] %v2241_v52  ;;  %v2091_v5 = vadd.f32 %v4693_v56, %v2090_v34  ;;  %v2206_v16 = vpop.f32.mrf.mxu3 }
 0x1f2   : > { %v2045_v25 = vpop.f32.mrf.mxu0 }
 0x1f3   : > { %v2204_v15 = vadd.f32 %v2203_v30, %v2091_v5  ;;  %v2046_v50 = vadd.f32 %v4693_v56, %v2045_v25 }
 0x1f5   : > { %v2257_v19 = vmax.f32 %v2204_v15, 0.0  ;;  %v2159_v31 = vadd.f32 %v4544_v6, %v2046_v50 }
 0x1f7   : > { %2289 = vst [vmem:[%s4705_s17 + $0xa8] sm:$0xff] %v2257_v19  ;;  %v2242_v36 = vmax.f32 %v2159_v31, 0.0 }
 0x1f8   : > { %v2093_v41 = vpop.f32.mrf.mxu2 }
 0x1f9   : > { %2274 = vst [vmem:[%s4705_s17 + $0x30] sm:$0xff] %v2242_v36  ;;  %v2094_v24 = vadd.f32 %v4693_v56, %v2093_v41  ;;  %v2209_v37 = vpop.f32.mrf.mxu3 }
 0x1fa   : > { %v2048_v44 = vpop.f32.mrf.mxu0 }
 0x1fb   : > { %v2207_v61 = vadd.f32 %v2206_v16, %v2094_v24  ;;  %v2049_v18 = vadd.f32 %v4693_v56, %v2048_v44  ;;  %v2121_v44 = vadd.f32 %v4693_v56, %v4709_v10 }
 0x1fd   : > { %v2258_v54 = vmax.f32 %v2207_v61, 0.0  ;;  %v2162_v35 = vadd.f32 %v4567_v21, %v2049_v18 }
 0x1ff   : > { %2290 = vst [vmem:[%s4705_s17 + $0xb0] sm:$0xff] %v2258_v54  ;;  %v2243_v14 = vmax.f32 %v2162_v35, 0.0 }
 0x200   : > { %v2096_v11 = vpop.f32.mrf.mxu2 }
 0x201   : > { %2275 = vst [vmem:[%s4705_s17 + $0x38] sm:$0xff] %v2243_v14  ;;  %v2097_v6 = vadd.f32 %v4693_v56, %v2096_v11  ;;  %v2212_v43 = vpop.f32.mrf.mxu3 }
 0x202   : > { %v2051_v47 = vpop.f32.mrf.mxu0 }
 0x203   : > { %v2210_v51 = vadd.f32 %v2209_v37, %v2097_v6  ;;  %v2052_v57 = vadd.f32 %v4693_v56, %v2051_v47 }
 0x205   : > { %v2259_v20 = vmax.f32 %v2210_v51, 0.0  ;;  %v2165_v53 = vadd.f32 %v4583_v1, %v2052_v57 }
 0x207   : > { %2291 = vst [vmem:[%s4705_s17 + $0xb8] sm:$0xff] %v2259_v20  ;;  %v2244_v45 = vmax.f32 %v2165_v53, 0.0 }
 0x208   : > { %v2099_v42 = vpop.f32.mrf.mxu2 }
 0x209   : > { %2276 = vst [vmem:[%s4705_s17 + $0x40] sm:$0xff] %v2244_v45  ;;  %v2100_v21 = vadd.f32 %v4693_v56, %v2099_v42  ;;  %v2215_v32 = vpop.f32.mrf.mxu3 }
 0x20a   : > { %v2054_v0 = vpop.f32.mrf.mxu0 }
 0x20b   : > { %v2213_v39 = vadd.f32 %v2212_v43, %v2100_v21  ;;  %v2055_v40 = vadd.f32 %v4693_v56, %v2054_v0 }
 0x20d   : > { %v2260_v2 = vmax.f32 %v2213_v39, 0.0  ;;  %v2168_v58 = vadd.f32 %v4603_v63, %v2055_v40 }
 0x20f   : > { %2292 = vst [vmem:[%s4705_s17 + $0xc0] sm:$0xff] %v2260_v2  ;;  %v2245_v17 = vmax.f32 %v2168_v58, 0.0 }
 0x210   : > { %v2102_v23 = vpop.f32.mrf.mxu2 }
 0x211   : > { %2277 = vst [vmem:[%s4705_s17 + $0x48] sm:$0xff] %v2245_v17  ;;  %v2103_v1 = vadd.f32 %v4693_v56, %v2102_v23  ;;  %v2218_v7 = vpop.f32.mrf.mxu3 }
 0x213   : > { %v2216_v8 = vadd.f32 %v2215_v32, %v2103_v1  ;;  %v2057_v4 = vpop.f32.mrf.mxu0 }
 0x214   : > { %v2058_v46 = vadd.f32 %v4693_v56, %v2057_v4 }
 0x215   : > { %v2261_v3 = vmax.f32 %v2216_v8, 0.0 }
 0x216   : > { %v2171_v28 = vadd.f32 %v4615_v27, %v2058_v46 }
 0x217   : > { %2293 = vst [vmem:[%s4705_s17 + $0xc8] sm:$0xff] %v2261_v3 }
 0x218   : > { %v2246_v9 = vmax.f32 %v2171_v28, 0.0 }
 0x219   : > { %v2221_v60 = vpop.f32.mrf.mxu3 }
 0x21a   : > { %2278 = vst [vmem:[%s4705_s17 + $0x50] sm:$0xff] %v2246_v9  ;;  %v2105_v63 = vpop.f32.mrf.mxu2 }
 0x21b   : > { %v2106_v22 = vadd.f32 %v4693_v56, %v2105_v63  ;;  %v2060_v59 = vpop.f32.mrf.mxu0 }
 0x21c   : > { %v2061_v26 = vadd.f32 %v4693_v56, %v2060_v59 }
 0x21d   : > { %v2219_v30 = vadd.f32 %v2218_v7, %v2106_v22 }
 0x21e   : > { %v2174_v48 = vadd.f32 %v4633_v29, %v2061_v26 }
 0x21f   : > { %v2262_v13 = vmax.f32 %v2219_v30, 0.0 }
 0x220   : > { %v2247_v38 = vmax.f32 %v2174_v48, 0.0 }
 0x221   : > { %2294 = vst [vmem:[%s4705_s17 + $0xd0] sm:$0xff] %v2262_v13  ;;  %v2224_v55 = vpop.f32.mrf.mxu3 }
 0x222   : > { %2279 = vst [vmem:[%s4705_s17 + $0x58] sm:$0xff] %v2247_v38  ;;  %v2108_v27 = vpop.f32.mrf.mxu2 }
 0x223   : > { %v2109_v12 = vadd.f32 %v4693_v56, %v2108_v27 }
 0x225   : > { %v2222_v52 = vadd.f32 %v2221_v60, %v2109_v12 }
 0x227   : > { %v2263_v34 = vmax.f32 %v2222_v52, 0.0 }
 0x229   : > { %2295 = vst [vmem:[%s4705_s17 + $0xd8] sm:$0xff] %v2263_v34  ;;  %v2227_v5 = vpop.f32.mrf.mxu3  ;;  %v2063_v16 = vpop.f32.mrf.mxu0 }
 0x22a   : > { %v2064_v25 = vadd.f32 %v4693_v56, %v2063_v16 }
 0x22c   : > { %v2177_v15 = vadd.f32 %v4651_v33, %v2064_v25 }
 0x22e   : > { %v2248_v29 = vmax.f32 %v2177_v15, 0.0 }
 0x22f   : > { %v2111_v50 = vpop.f32.mrf.mxu2 }
 0x230   : > { %2280 = vst [vmem:[%s4705_s17 + $0x60] sm:$0xff] %v2248_v29  ;;  %v2112_v19 = vadd.f32 %v4693_v56, %v2111_v50 }
 0x231   : > { %v2230_v31 = vpop.f32.mrf.mxu3 }
 0x232   : > { %v2225_v36 = vadd.f32 %v2224_v55, %v2112_v19 }
 0x234   : > { %v2264_v41 = vmax.f32 %v2225_v36, 0.0 }
 0x236   : > { %2296 = vst [vmem:[%s4705_s17 + $0xe0] sm:$0xff] %v2264_v41 }
 0x237   : > { %v2066_v24 = vpop.f32.mrf.mxu0  ;;  %v2114_v37 = vpop.f32.mrf.mxu2 }
 0x238   : > { %v2067_v33 = vadd.f32 %v4693_v56, %v2066_v24  ;;  %v2115_v61 = vadd.f32 %v4693_v56, %v2114_v37 }
 0x239   : > { %v2233_v18 = vpop.f32.mrf.mxu3 }
 0x23a   : > { %v2180_v54 = vadd.f32 %v4662_v49, %v2067_v33  ;;  %v2228_v35 = vadd.f32 %v2227_v5, %v2115_v61  ;;  %v2234_v14 = vadd.f32 %v2233_v18, %v2121_v44 }
 0x23c   : > { %v2249_v11 = vmax.f32 %v2180_v54, 0.0  ;;  %v2265_v6 = vmax.f32 %v2228_v35, 0.0  ;;  %v2267_v43 = vmax.f32 %v2234_v14, 0.0 }
 0x23e   : > { %2281 = vst [vmem:[%s4705_s17 + $0x68] sm:$0xff] %v2249_v11 }
 0x23f   : > { %2297 = vst [vmem:[%s4705_s17 + $0xe8] sm:$0xff] %v2265_v6  ;;  %v2069_v10 = vpop.f32.mrf.mxu0  ;;  %v2117_v47 = vpop.f32.mrf.mxu2 }
 0x240   : > { %2299 = vst [vmem:[%s4705_s17 + $0xf8] sm:$0xff] %v2267_v43  ;;  %v2070_v49 = vadd.f32 %v4693_v56, %v2069_v10  ;;  %v2118_v51 = vadd.f32 %v4693_v56, %v2117_v47 }
 0x242   : > { %v2183_v57 = vadd.f32 %v4675_v62, %v2070_v49  ;;  %v2231_v20 = vadd.f32 %v2230_v31, %v2118_v51 }
 0x244   : > { %v2250_v53 = vmax.f32 %v2183_v57, 0.0  ;;  %v2266_v45 = vmax.f32 %v2231_v20, 0.0 }
 0x246   : > { %2282 = vst [vmem:[%s4705_s17 + $0x70] sm:$0xff] %v2250_v53 }
 0x247   : > { %2298 = vst [vmem:[%s4705_s17 + $0xf0] sm:$0xff] %v2266_v45 }
 0x248   : > { %3091 = shalt.err (!%p3088_p3)
}
 0x249   : > { %s3136_s28 = smov 128   ;;  %s3137_s5 = smov 8  }
 0x24a   : > { %2456 = dma.vmem_to_hbm [thread:$0]  (%p3196_p5), %s2314_s16, 4096, %s2316_s7, %s2301_s8, %s3136_s28, %s3136_s28, %s3137_s5  }
 0x24b PF: > { %p2462_p4 = scmp.ge.s32.totalorder %s3126_s15, 2  ;;  %s2330_s10 = sand.u32 1, %s3114_s12  }
 0x24c   : > { %s2331_s11 = scalar_lea.sflag [#allocation3], %s2330_s10 }
 0x24d   : > { %p2459_p7 = pnand %p2462_p4, %p3200_p6 }
 0x24f   : > { %p2460_p8 = pneg %p2459_p7 }
 0x251   : > { %3109 = dma.done.wait (%p2460_p8), %s2331_s11, 4096  }
 0x252   : > { %3111 = vsyncadd (%p2460_p8), %s2331_s11, 4294963200  ;;  %p13_p9 = scmp.ge.s32.totalorder %s3183_s18, 4   ;;  %s5067_s12 = smov %s3118_s13 }
 0x253   : > { %s5068_s13 = smov %s3122_s14  ;;  %s5069_s14 = smov %s3194_s21 }
 0x254   : > { %s5070_s15 = smov %s3183_s18  ;;  %15 = sbr.rel (!%p13_p9) target bundleno = 3 (0x3), region = 67 }
 0x259   :  { %2337 = vsyncpa [#allocation3], 1 }
 0x25a   :  { %2339 = vsyncpa [#allocation3 + $0x1], 1 }

</bundles_post_ra>
